<compile_context>
chip_gen: v5e
topology: v5e:2x2
jax: 0.10.0
libtpu: 0.0.40
codegen_flags: <defaults>
</compile_context>

<pallas_src>
import math

import jax
import jax.numpy as jnp
from jax.experimental import pallas as pl
from jax.experimental.pallas import tpu as pltpu


# ------------------------------ fused kernel --------------------------------

def make_mnist_kernel(batch, hw_in, conv_channels):
    """Builds the fused forward kernel.

    Per-batch activations are 2-D slabs (H, W*C): H on sublanes, (w, c) merged
    on lanes.  Convs/pools/FC are all expressed as small 2-D matmuls, so the
    MXU does the reductions and the VPU only sees a few bias/ReLU/max passes.
    """
    n_conv = len(conv_channels)

    def kernel(*refs):
        idx = 0
        xp_ref = refs[idx]; idx += 1                     # (B, H+2, W+2) pre-padded
        layer_refs = []
        for _ in range(n_conv):
            layer_refs.append(refs[idx:idx + 5])          # ke, ko, se, so, bt
            idx += 5
        w1p_ref, b1_ref, w2_ref, b2_ref = refs[idx:idx + 4]; idx += 4
        o_ref = refs[idx]; idx += 1
        pad_refs = refs[idx:idx + n_conv - 1]; idx += n_conv - 1
        feats_ref = refs[idx]                             # (B, C*hw_out*hw_out)

        # Zero the inter-layer padded scratches once: the halo stays zero and
        # only the interior is rewritten for every batch element.
        for pr in pad_refs:
            pr[...] = jnp.zeros(pr.shape, jnp.float32)

        for b in range(batch):
            hw = hw_in
            pooled = None
            for li, cout in enumerate(conv_channels):
                ke_ref, ko_ref, se_ref, so_ref, bt_ref = layer_refs[li]
                h2 = hw // 2

                # ---- 3x3 conv as 6 banded matmuls (3 dy x even/odd w) ----
                ye = None
                yo = None
                for dy in range(3):
                    if li == 0:
                        lhs = xp_ref[b, dy:dy + hw, :]                # (hw, hw+2)
                    else:
                        lhs = pad_refs[li - 1][dy:dy + hw, :]         # (hw, (hw+2)*cin)
                    pe = jnp.dot(lhs, ke_ref[dy],
                                 preferred_element_type=jnp.float32)
                    po = jnp.dot(lhs, ko_ref[dy],
                                 preferred_element_type=jnp.float32)
                    ye = pe if ye is None else ye + pe
                    yo = po if yo is None else yo + po

                # ---- bias + ReLU + W-pool (even/odd columns) ----
                z = jnp.maximum(jnp.maximum(ye, yo) + bt_ref[...], 0.0)

                # ---- H-pool via 0/1 row-selection matmuls on the MXU ----
                pooled = jnp.maximum(
                    jnp.dot(se_ref[...], z, preferred_element_type=jnp.float32),
                    jnp.dot(so_ref[...], z, preferred_element_type=jnp.float32))

                if li + 1 < n_conv:
                    # Write into the interior of the next layer's padded slab:
                    # rows [1, h2+1), lane blocks [cout, (h2+1)*cout).
                    pad_refs[li][1:h2 + 1, cout:(h2 + 1) * cout] = pooled

                hw = h2

            # ---- flatten final (hw, hw*cout) slab into feats[b, :] in
            #      (h, w, c) order (fc1 weight is pre-permuted to match) ----
            width = hw * conv_channels[-1]
            for h in range(hw):
                feats_ref[b:b + 1, h * width:(h + 1) * width] = pooled[h:h + 1, :]

        # ---- FC head: fc1 (one K=392 matmul) + ReLU, fc2, log_softmax ----
        hidden = jnp.maximum(
            jnp.dot(feats_ref[...], w1p_ref[...],
                    preferred_element_type=jnp.float32) + b1_ref[...], 0.0)
        logits = jnp.dot(hidden, w2_ref[...],
                         preferred_element_type=jnp.float32) + b2_ref[...]
        m = jnp.max(logits, axis=-1, keepdims=True)
        s = logits - m
        lse = jnp.log(jnp.sum(jnp.exp(s), axis=-1, keepdims=True))
        o_ref[...] = s - lse

    return kernel


# --------------------------- wrapper / weight prep --------------------------

def _build_band_matrices(w_hwio, hw):
    """Banded block-Toeplitz conv matrices for one layer.

    Returns (ke, ko), each (3, (hw+2)*cin, (hw//2)*cout), such that for the
    padded input slab P (rows hp, lanes wp*cin+ci):
        conv_out[h, 2*w2 + parity, co] =
            sum_dy  (P[h+dy, :] @ k_parity[dy])[w2*cout + co]
    """
    _, _, cin, cout = w_hwio.shape
    wp_count = hw + 2
    w2_count = hw // 2
    wp = jnp.arange(wp_count)
    w2 = jnp.arange(w2_count)
    out = []
    for parity in (0, 1):
        dx = wp[:, None] - (2 * w2[None, :] + parity)          # (Wp, W2)
        valid = ((dx >= 0) & (dx < 3)).astype(w_hwio.dtype)
        dxc = jnp.clip(dx, 0, 2)
        per_dy = []
        for dy in range(3):
            blk = w_hwio[dy][dxc] * valid[..., None, None]     # (Wp, W2, cin, cout)
            blk = jnp.transpose(blk, (0, 2, 1, 3)).reshape(
                wp_count * cin, w2_count * cout)
            per_dy.append(blk)
        out.append(jnp.stack(per_dy, axis=0))
    return out[0], out[1]


def _pool_select(hw):
    """0/1 row-selection matrices (hw//2, hw) picking even / odd rows."""
    rows = jnp.arange(hw // 2)
    cols = jnp.arange(hw)
    se = (cols[None, :] == 2 * rows[:, None]).astype(jnp.float32)
    so = (cols[None, :] == 2 * rows[:, None] + 1).astype(jnp.float32)
    return se, so


def mnist_forward(x_nchw, params):
    convs = params["convs"]
    w1, b1, w2, b2 = params["fc"]
    batch, cin0, hw, hw2 = x_nchw.shape
    assert cin0 == 1 and hw == hw2
    conv_channels = [int(w.shape[-1]) for (w, _) in convs]
    n_conv = len(convs)
    hw_out = hw // (2 ** n_conv)
    c_out = conv_channels[-1]
    n_cls = int(w2.shape[-1])

    # Pre-pad the network input once (tiny, host/XLA side): (B, H+2, W+2).
    xp = jnp.pad(x_nchw[:, 0].astype(jnp.float32), ((0, 0), (1, 1), (1, 1)))

    # Per-layer precomputed operands + inter-layer padded scratch shapes.
    layer_args = []
    scratch = []
    h = hw
    for li, (w, b) in enumerate(convs):
        cout = conv_channels[li]
        ke, ko = _build_band_matrices(w.astype(jnp.float32), h)
        se, so = _pool_select(h)
        bt = jnp.tile(b.astype(jnp.float32).reshape(1, cout), (1, h // 2))
        layer_args += [ke, ko, se, so, bt]
        h = h // 2
        if li + 1 < n_conv:
            scratch.append(pltpu.VMEM((h + 2, (h + 2) * cout), jnp.float32))
    scratch.append(pltpu.VMEM((batch, c_out * hw_out * hw_out), jnp.float32))

    # fc1 weight permuted from torch's (c, h, w) flatten to our (h, w, c).
    w1p = (w1.astype(jnp.float32)
             .reshape(c_out, hw_out, hw_out, w1.shape[1])
             .transpose(1, 2, 0, 3)
             .reshape(c_out * hw_out * hw_out, w1.shape[1]))

    kernel = make_mnist_kernel(batch, hw, conv_channels)

    # Working set is < 1 MiB of VMEM (all inputs + scratch), so the default
    # scoped VMEM limit is ample on every generation (incl. v7x 64 MiB/TC).
    return pl.pallas_call(
        kernel,
        out_shape=jax.ShapeDtypeStruct((batch, n_cls), jnp.float32),
        scratch_shapes=scratch,
    )(xp, *layer_args, w1p, b1.astype(jnp.float32),
      w2.astype(jnp.float32), b2.astype(jnp.float32))


# --------------------------- reference / params -----------------------------

def reference_forward(x_nchw, params):
    x = x_nchw
    for (w, b) in params["convs"]:
        y = jax.lax.conv_general_dilated(
            x, w, window_strides=(1, 1), padding="SAME",
            dimension_numbers=("NCHW", "HWIO", "NCHW"),
            precision=jax.lax.Precision.HIGHEST)
        y = jax.nn.relu(y + b.reshape(1, -1, 1, 1))
        x = jax.lax.reduce_window(y, -jnp.inf, jax.lax.max,
                                  (1, 1, 2, 2), (1, 1, 2, 2), "VALID")
    feats = x.reshape(x.shape[0], -1)
    w1, b1, w2, b2 = params["fc"]
    h = jax.nn.relu(jnp.dot(feats, w1, precision=jax.lax.Precision.HIGHEST) + b1)
    logits = jnp.dot(h, w2, precision=jax.lax.Precision.HIGHEST) + b2
    return jax.nn.log_softmax(logits, axis=1)


def init_params(key, conv_layers):
    """Deterministic synthetic params. Conv weights stored HWIO, linear weights
    stored (in, out); biases stored (1, out) — functionally identical to the
    PyTorch parameterization."""
    params = {"convs": []}
    cin = 1
    for cout in conv_layers:
        key, kw, kb = jax.random.split(key, 3)
        bound = 1.0 / math.sqrt(cin * 9)
        w = jax.random.uniform(kw, (3, 3, cin, cout), jnp.float32, -bound, bound)
        b = jax.random.uniform(kb, (1, cout), jnp.float32, -bound, bound)
        params["convs"].append((w, b))
        cin = cout
    fc_features = conv_layers[-1] * 7 * 7
    key, k1, k2, k3, k4 = jax.random.split(key, 5)
    bd1 = 1.0 / math.sqrt(fc_features)
    bd2 = 1.0 / math.sqrt(100)
    w1 = jax.random.uniform(k1, (fc_features, 100), jnp.float32, -bd1, bd1)
    b1 = jax.random.uniform(k2, (1, 100), jnp.float32, -bd1, bd1)
    w2 = jax.random.uniform(k3, (100, 10), jnp.float32, -bd2, bd2)
    b2 = jax.random.uniform(k4, (1, 10), jnp.float32, -bd2, bd2)
    params["fc"] = (w1, b1, w2, b2)
    return params


# ---------------------------------- main ------------------------------------

if __name__ == "__main__":
    # MNISTNet(conv_layers=[4, 8]): 28 -> 14 -> 7 spatial, fc_features = 8*7*7.
    conv_layers = [4, 8]
    key = jax.random.PRNGKey(0)
    key, kx, kp = jax.random.split(key, 3)
    x = jax.random.normal(kx, (2, 1, 28, 28), jnp.float32)   # NCHW, batch=2
    params = init_params(kp, conv_layers)

    out = jax.jit(mnist_forward)(x, params)
    out = jax.block_until_ready(out)

    ref = reference_forward(x, params)
    assert out.shape == (2, 10), out.shape
    assert bool(jnp.all(jnp.isfinite(out)))
    # log_softmax rows must normalize
    assert bool(jnp.allclose(jnp.sum(jnp.exp(out), axis=1), 1.0, atol=1e-3))
    # Match the XLA HIGHEST-precision reference; tolerance covers the MXU's
    # default bf16-pass f32 matmul path used for the in-kernel conv/fc dots.
    assert bool(jnp.allclose(out, ref, atol=5e-2, rtol=5e-2)), (
        float(jnp.max(jnp.abs(out - ref))))

    print("KERNEL_OK")
</pallas_src>

<mosaic_0001>
module attributes {stable_mosaic.version = 11 : i64} {
  func.func @kernel(%arg0: memref<2x30x30xf32, #tpu.memory_space<vmem>>, %arg1: memref<3x30x56xf32, #tpu.memory_space<vmem>>, %arg2: memref<3x30x56xf32, #tpu.memory_space<vmem>>, %arg3: memref<14x28xf32, #tpu.memory_space<vmem>>, %arg4: memref<14x28xf32, #tpu.memory_space<vmem>>, %arg5: memref<1x56xf32, #tpu.memory_space<vmem>>, %arg6: memref<3x64x56xf32, #tpu.memory_space<vmem>>, %arg7: memref<3x64x56xf32, #tpu.memory_space<vmem>>, %arg8: memref<7x14xf32, #tpu.memory_space<vmem>>, %arg9: memref<7x14xf32, #tpu.memory_space<vmem>>, %arg10: memref<1x56xf32, #tpu.memory_space<vmem>>, %arg11: memref<392x100xf32, #tpu.memory_space<vmem>>, %arg12: memref<1x100xf32, #tpu.memory_space<vmem>>, %arg13: memref<100x10xf32, #tpu.memory_space<vmem>>, %arg14: memref<1x10xf32, #tpu.memory_space<vmem>>, %arg15: memref<2x10xf32, #tpu.memory_space<vmem>>, %arg16: memref<16x64xf32, #tpu.memory_space<vmem>>, %arg17: memref<2x392xf32, #tpu.memory_space<vmem>>) attributes {dimension_semantics = [], scalar_prefetch = 0 : i64, scratch_operands = 2 : i64, tpu.core_type = #tpu.core_type<tc>} {
    %cst = arith.constant 0.000000e+00 : f32
    %0 = vector.broadcast %cst : f32 to vector<16x64xf32>
    %c0 = arith.constant 0 : index
    %c0_0 = arith.constant 0 : index
    %1 = vector.load %arg16[%c0, %c0_0] : memref<16x64xf32, #tpu.memory_space<vmem>>, vector<16x64xf32>
    tpu.vector_store %arg16[%c0, %c0_0], %0 {strides = array<i32>} : memref<16x64xf32, #tpu.memory_space<vmem>>, vector<16x64xf32>,
    %c0_1 = arith.constant 0 : index
    %c0_2 = arith.constant 0 : index
    %c0_3 = arith.constant 0 : index
    %2 = vector.load %arg0[%c0_1, %c0_2, %c0_3] : memref<2x30x30xf32, #tpu.memory_space<vmem>>, vector<1x28x30xf32>
    %3 = vector.shape_cast %2 : vector<1x28x30xf32> to vector<28x30xf32>
    %c0_4 = arith.constant 0 : index
    %c0_5 = arith.constant 0 : index
    %c0_6 = arith.constant 0 : index
    %4 = vector.load %arg1[%c0_4, %c0_5, %c0_6] : memref<3x30x56xf32, #tpu.memory_space<vmem>>, vector<1x30x56xf32>
    %5 = vector.shape_cast %4 : vector<1x30x56xf32> to vector<30x56xf32>
    %cst_7 = arith.constant dense<0.000000e+00> : vector<28x56xf32>
    %6 = tpu.matmul %3, %5, %cst_7 {dimension_numbers = #tpu.dot_dimension_numbers<[1], [0], [0], [1], [0, 0, 1, 1], [], []>} : vector<28x30xf32>, vector<30x56xf32>, vector<28x56xf32> -> vector<28x56xf32>
    %c0_8 = arith.constant 0 : index
    %c0_9 = arith.constant 0 : index
    %c0_10 = arith.constant 0 : index
    %7 = vector.load %arg2[%c0_8, %c0_9, %c0_10] : memref<3x30x56xf32, #tpu.memory_space<vmem>>, vector<1x30x56xf32>
    %8 = vector.shape_cast %7 : vector<1x30x56xf32> to vector<30x56xf32>
    %cst_11 = arith.constant dense<0.000000e+00> : vector<28x56xf32>
    %9 = tpu.matmul %3, %8, %cst_11 {dimension_numbers = #tpu.dot_dimension_numbers<[1], [0], [0], [1], [0, 0, 1, 1], [], []>} : vector<28x30xf32>, vector<30x56xf32>, vector<28x56xf32> -> vector<28x56xf32>
    %c0_12 = arith.constant 0 : index
    %c1 = arith.constant 1 : index
    %c0_13 = arith.constant 0 : index
    %10 = vector.load %arg0[%c0_12, %c1, %c0_13] : memref<2x30x30xf32, #tpu.memory_space<vmem>>, vector<1x28x30xf32>
    %11 = vector.shape_cast %10 : vector<1x28x30xf32> to vector<28x30xf32>
    %c1_14 = arith.constant 1 : index
    %c0_15 = arith.constant 0 : index
    %c0_16 = arith.constant 0 : index
    %12 = vector.load %arg1[%c1_14, %c0_15, %c0_16] : memref<3x30x56xf32, #tpu.memory_space<vmem>>, vector<1x30x56xf32>
    %13 = vector.shape_cast %12 : vector<1x30x56xf32> to vector<30x56xf32>
    %cst_17 = arith.constant dense<0.000000e+00> : vector<28x56xf32>
    %14 = tpu.matmul %11, %13, %cst_17 {dimension_numbers = #tpu.dot_dimension_numbers<[1], [0], [0], [1], [0, 0, 1, 1], [], []>} : vector<28x30xf32>, vector<30x56xf32>, vector<28x56xf32> -> vector<28x56xf32>
    %c1_18 = arith.constant 1 : index
    %c0_19 = arith.constant 0 : index
    %c0_20 = arith.constant 0 : index
    %15 = vector.load %arg2[%c1_18, %c0_19, %c0_20] : memref<3x30x56xf32, #tpu.memory_space<vmem>>, vector<1x30x56xf32>
    %16 = vector.shape_cast %15 : vector<1x30x56xf32> to vector<30x56xf32>
    %cst_21 = arith.constant dense<0.000000e+00> : vector<28x56xf32>
    %17 = tpu.matmul %11, %16, %cst_21 {dimension_numbers = #tpu.dot_dimension_numbers<[1], [0], [0], [1], [0, 0, 1, 1], [], []>} : vector<28x30xf32>, vector<30x56xf32>, vector<28x56xf32> -> vector<28x56xf32>
    %18 = arith.addf %6, %14 : vector<28x56xf32>
    %19 = arith.addf %9, %17 : vector<28x56xf32>
    %c0_22 = arith.constant 0 : index
    %c2 = arith.constant 2 : index
    %c0_23 = arith.constant 0 : index
    %20 = vector.load %arg0[%c0_22, %c2, %c0_23] : memref<2x30x30xf32, #tpu.memory_space<vmem>>, vector<1x28x30xf32>
    %21 = vector.shape_cast %20 : vector<1x28x30xf32> to vector<28x30xf32>
    %c2_24 = arith.constant 2 : index
    %c0_25 = arith.constant 0 : index
    %c0_26 = arith.constant 0 : index
    %22 = vector.load %arg1[%c2_24, %c0_25, %c0_26] : memref<3x30x56xf32, #tpu.memory_space<vmem>>, vector<1x30x56xf32>
    %23 = vector.shape_cast %22 : vector<1x30x56xf32> to vector<30x56xf32>
    %cst_27 = arith.constant dense<0.000000e+00> : vector<28x56xf32>
    %24 = tpu.matmul %21, %23, %cst_27 {dimension_numbers = #tpu.dot_dimension_numbers<[1], [0], [0], [1], [0, 0, 1, 1], [], []>} : vector<28x30xf32>, vector<30x56xf32>, vector<28x56xf32> -> vector<28x56xf32>
    %c2_28 = arith.constant 2 : index
    %c0_29 = arith.constant 0 : index
    %c0_30 = arith.constant 0 : index
    %25 = vector.load %arg2[%c2_28, %c0_29, %c0_30] : memref<3x30x56xf32, #tpu.memory_space<vmem>>, vector<1x30x56xf32>
    %26 = vector.shape_cast %25 : vector<1x30x56xf32> to vector<30x56xf32>
    %cst_31 = arith.constant dense<0.000000e+00> : vector<28x56xf32>
    %27 = tpu.matmul %21, %26, %cst_31 {dimension_numbers = #tpu.dot_dimension_numbers<[1], [0], [0], [1], [0, 0, 1, 1], [], []>} : vector<28x30xf32>, vector<30x56xf32>, vector<28x56xf32> -> vector<28x56xf32>
    %28 = arith.addf %18, %24 : vector<28x56xf32>
    %29 = arith.addf %19, %27 : vector<28x56xf32>
    %30 = arith.maximumf %28, %29 : vector<28x56xf32>
    %c0_32 = arith.constant 0 : index
    %c0_33 = arith.constant 0 : index
    %31 = vector.load %arg5[%c0_32, %c0_33] : memref<1x56xf32, #tpu.memory_space<vmem>>, vector<1x56xf32>
    %32 = vector.broadcast %31 : vector<1x56xf32> to vector<28x56xf32>
    %33 = arith.addf %30, %32 : vector<28x56xf32>
    %cst_34 = arith.constant 0.000000e+00 : f32
    %34 = vector.broadcast %cst_34 : f32 to vector<28x56xf32>
    %35 = arith.maximumf %33, %34 : vector<28x56xf32>
    %c0_35 = arith.constant 0 : index
    %c0_36 = arith.constant 0 : index
    %36 = vector.load %arg3[%c0_35, %c0_36] : memref<14x28xf32, #tpu.memory_space<vmem>>, vector<14x28xf32>
    %cst_37 = arith.constant dense<0.000000e+00> : vector<14x56xf32>
    %37 = tpu.matmul %36, %35, %cst_37 {dimension_numbers = #tpu.dot_dimension_numbers<[1], [0], [0], [1], [0, 0, 1, 1], [], []>} : vector<14x28xf32>, vector<28x56xf32>, vector<14x56xf32> -> vector<14x56xf32>
    %c0_38 = arith.constant 0 : index
    %c0_39 = arith.constant 0 : index
    %38 = vector.load %arg4[%c0_38, %c0_39] : memref<14x28xf32, #tpu.memory_space<vmem>>, vector<14x28xf32>
    %cst_40 = arith.constant dense<0.000000e+00> : vector<14x56xf32>
    %39 = tpu.matmul %38, %35, %cst_40 {dimension_numbers = #tpu.dot_dimension_numbers<[1], [0], [0], [1], [0, 0, 1, 1], [], []>} : vector<14x28xf32>, vector<28x56xf32>, vector<14x56xf32> -> vector<14x56xf32>
    %40 = arith.maximumf %37, %39 : vector<14x56xf32>
    %c1_41 = arith.constant 1 : index
    %c4 = arith.constant 4 : index
    %41 = vector.load %arg16[%c1_41, %c4] : memref<16x64xf32, #tpu.memory_space<vmem>>, vector<14x56xf32>
    tpu.vector_store %arg16[%c1_41, %c4], %40 {strides = array<i32>} : memref<16x64xf32, #tpu.memory_space<vmem>>, vector<14x56xf32>,
    %c0_42 = arith.constant 0 : index
    %c0_43 = arith.constant 0 : index
    %42 = vector.load %arg16[%c0_42, %c0_43] : memref<16x64xf32, #tpu.memory_space<vmem>>, vector<14x64xf32>
    %c0_44 = arith.constant 0 : index
    %c0_45 = arith.constant 0 : index
    %c0_46 = arith.constant 0 : index
    %43 = vector.load %arg6[%c0_44, %c0_45, %c0_46] : memref<3x64x56xf32, #tpu.memory_space<vmem>>, vector<1x64x56xf32>
    %44 = vector.shape_cast %43 : vector<1x64x56xf32> to vector<64x56xf32>
    %cst_47 = arith.constant dense<0.000000e+00> : vector<14x56xf32>
    %45 = tpu.matmul %42, %44, %cst_47 {dimension_numbers = #tpu.dot_dimension_numbers<[1], [0], [0], [1], [0, 0, 1, 1], [], []>} : vector<14x64xf32>, vector<64x56xf32>, vector<14x56xf32> -> vector<14x56xf32>
    %c0_48 = arith.constant 0 : index
    %c0_49 = arith.constant 0 : index
    %c0_50 = arith.constant 0 : index
    %46 = vector.load %arg7[%c0_48, %c0_49, %c0_50] : memref<3x64x56xf32, #tpu.memory_space<vmem>>, vector<1x64x56xf32>
    %47 = vector.shape_cast %46 : vector<1x64x56xf32> to vector<64x56xf32>
    %cst_51 = arith.constant dense<0.000000e+00> : vector<14x56xf32>
    %48 = tpu.matmul %42, %47, %cst_51 {dimension_numbers = #tpu.dot_dimension_numbers<[1], [0], [0], [1], [0, 0, 1, 1], [], []>} : vector<14x64xf32>, vector<64x56xf32>, vector<14x56xf32> -> vector<14x56xf32>
    %c1_52 = arith.constant 1 : index
    %c0_53 = arith.constant 0 : index
    %49 = vector.load %arg16[%c1_52, %c0_53] : memref<16x64xf32, #tpu.memory_space<vmem>>, vector<14x64xf32>
    %c1_54 = arith.constant 1 : index
    %c0_55 = arith.constant 0 : index
    %c0_56 = arith.constant 0 : index
    %50 = vector.load %arg6[%c1_54, %c0_55, %c0_56] : memref<3x64x56xf32, #tpu.memory_space<vmem>>, vector<1x64x56xf32>
    %51 = vector.shape_cast %50 : vector<1x64x56xf32> to vector<64x56xf32>
    %cst_57 = arith.constant dense<0.000000e+00> : vector<14x56xf32>
    %52 = tpu.matmul %49, %51, %cst_57 {dimension_numbers = #tpu.dot_dimension_numbers<[1], [0], [0], [1], [0, 0, 1, 1], [], []>} : vector<14x64xf32>, vector<64x56xf32>, vector<14x56xf32> -> vector<14x56xf32>
    %c1_58 = arith.constant 1 : index
    %c0_59 = arith.constant 0 : index
    %c0_60 = arith.constant 0 : index
    %53 = vector.load %arg7[%c1_58, %c0_59, %c0_60] : memref<3x64x56xf32, #tpu.memory_space<vmem>>, vector<1x64x56xf32>
    %54 = vector.shape_cast %53 : vector<1x64x56xf32> to vector<64x56xf32>
    %cst_61 = arith.constant dense<0.000000e+00> : vector<14x56xf32>
    %55 = tpu.matmul %49, %54, %cst_61 {dimension_numbers = #tpu.dot_dimension_numbers<[1], [0], [0], [1], [0, 0, 1, 1], [], []>} : vector<14x64xf32>, vector<64x56xf32>, vector<14x56xf32> -> vector<14x56xf32>
    %56 = arith.addf %45, %52 : vector<14x56xf32>
    %57 = arith.addf %48, %55 : vector<14x56xf32>
    %c2_62 = arith.constant 2 : index
    %c0_63 = arith.constant 0 : index
    %58 = vector.load %arg16[%c2_62, %c0_63] : memref<16x64xf32, #tpu.memory_space<vmem>>, vector<14x64xf32>
    %c2_64 = arith.constant 2 : index
    %c0_65 = arith.constant 0 : index
    %c0_66 = arith.constant 0 : index
    %59 = vector.load %arg6[%c2_64, %c0_65, %c0_66] : memref<3x64x56xf32, #tpu.memory_space<vmem>>, vector<1x64x56xf32>
    %60 = vector.shape_cast %59 : vector<1x64x56xf32> to vector<64x56xf32>
    %cst_67 = arith.constant dense<0.000000e+00> : vector<14x56xf32>
    %61 = tpu.matmul %58, %60, %cst_67 {dimension_numbers = #tpu.dot_dimension_numbers<[1], [0], [0], [1], [0, 0, 1, 1], [], []>} : vector<14x64xf32>, vector<64x56xf32>, vector<14x56xf32> -> vector<14x56xf32>
    %c2_68 = arith.constant 2 : index
    %c0_69 = arith.constant 0 : index
    %c0_70 = arith.constant 0 : index
    %62 = vector.load %arg7[%c2_68, %c0_69, %c0_70] : memref<3x64x56xf32, #tpu.memory_space<vmem>>, vector<1x64x56xf32>
    %63 = vector.shape_cast %62 : vector<1x64x56xf32> to vector<64x56xf32>
    %cst_71 = arith.constant dense<0.000000e+00> : vector<14x56xf32>
    %64 = tpu.matmul %58, %63, %cst_71 {dimension_numbers = #tpu.dot_dimension_numbers<[1], [0], [0], [1], [0, 0, 1, 1], [], []>} : vector<14x64xf32>, vector<64x56xf32>, vector<14x56xf32> -> vector<14x56xf32>
    %65 = arith.addf %56, %61 : vector<14x56xf32>
    %66 = arith.addf %57, %64 : vector<14x56xf32>
    %67 = arith.maximumf %65, %66 : vector<14x56xf32>
    %c0_72 = arith.constant 0 : index
    %c0_73 = arith.constant 0 : index
    %68 = vector.load %arg10[%c0_72, %c0_73] : memref<1x56xf32, #tpu.memory_space<vmem>>, vector<1x56xf32>
    %69 = vector.broadcast %68 : vector<1x56xf32> to vector<14x56xf32>
    %70 = arith.addf %67, %69 : vector<14x56xf32>
    %cst_74 = arith.constant 0.000000e+00 : f32
    %71 = vector.broadcast %cst_74 : f32 to vector<14x56xf32>
    %72 = arith.maximumf %70, %71 : vector<14x56xf32>
    %c0_75 = arith.constant 0 : index
    %c0_76 = arith.constant 0 : index
    %73 = vector.load %arg8[%c0_75, %c0_76] : memref<7x14xf32, #tpu.memory_space<vmem>>, vector<7x14xf32>
    %cst_77 = arith.constant dense<0.000000e+00> : vector<7x56xf32>
    %74 = tpu.matmul %73, %72, %cst_77 {dimension_numbers = #tpu.dot_dimension_numbers<[1], [0], [0], [1], [0, 0, 1, 1], [], []>} : vector<7x14xf32>, vector<14x56xf32>, vector<7x56xf32> -> vector<7x56xf32>
    %c0_78 = arith.constant 0 : index
    %c0_79 = arith.constant 0 : index
    %75 = vector.load %arg9[%c0_78, %c0_79] : memref<7x14xf32, #tpu.memory_space<vmem>>, vector<7x14xf32>
    %cst_80 = arith.constant dense<0.000000e+00> : vector<7x56xf32>
    %76 = tpu.matmul %75, %72, %cst_80 {dimension_numbers = #tpu.dot_dimension_numbers<[1], [0], [0], [1], [0, 0, 1, 1], [], []>} : vector<7x14xf32>, vector<14x56xf32>, vector<7x56xf32> -> vector<7x56xf32>
    %77 = arith.maximumf %74, %76 : vector<7x56xf32>
    %78 = vector.extract_strided_slice %77 {offsets = [0, 0], sizes = [1, 56], strides = [1, 1]} : vector<7x56xf32> to vector<1x56xf32>
    %c0_81 = arith.constant 0 : index
    %c0_82 = arith.constant 0 : index
    %79 = vector.load %arg17[%c0_81, %c0_82] : memref<2x392xf32, #tpu.memory_space<vmem>>, vector<1x56xf32>
    tpu.vector_store %arg17[%c0_81, %c0_82], %78 {strides = array<i32>} : memref<2x392xf32, #tpu.memory_space<vmem>>, vector<1x56xf32>,
    %80 = vector.extract_strided_slice %77 {offsets = [1, 0], sizes = [1, 56], strides = [1, 1]} : vector<7x56xf32> to vector<1x56xf32>
    %c0_83 = arith.constant 0 : index
    %c56 = arith.constant 56 : index
    %81 = vector.load %arg17[%c0_83, %c56] : memref<2x392xf32, #tpu.memory_space<vmem>>, vector<1x56xf32>
    tpu.vector_store %arg17[%c0_83, %c56], %80 {strides = array<i32>} : memref<2x392xf32, #tpu.memory_space<vmem>>, vector<1x56xf32>,
    %82 = vector.extract_strided_slice %77 {offsets = [2, 0], sizes = [1, 56], strides = [1, 1]} : vector<7x56xf32> to vector<1x56xf32>
    %c0_84 = arith.constant 0 : index
    %c112 = arith.constant 112 : index
    %83 = vector.load %arg17[%c0_84, %c112] : memref<2x392xf32, #tpu.memory_space<vmem>>, vector<1x56xf32>
    tpu.vector_store %arg17[%c0_84, %c112], %82 {strides = array<i32>} : memref<2x392xf32, #tpu.memory_space<vmem>>, vector<1x56xf32>,
    %84 = vector.extract_strided_slice %77 {offsets = [3, 0], sizes = [1, 56], strides = [1, 1]} : vector<7x56xf32> to vector<1x56xf32>
    %c0_85 = arith.constant 0 : index
    %c168 = arith.constant 168 : index
    %85 = vector.load %arg17[%c0_85, %c168] : memref<2x392xf32, #tpu.memory_space<vmem>>, vector<1x56xf32>
    tpu.vector_store %arg17[%c0_85, %c168], %84 {strides = array<i32>} : memref<2x392xf32, #tpu.memory_space<vmem>>, vector<1x56xf32>,
    %86 = vector.extract_strided_slice %77 {offsets = [4, 0], sizes = [1, 56], strides = [1, 1]} : vector<7x56xf32> to vector<1x56xf32>
    %c0_86 = arith.constant 0 : index
    %c224 = arith.constant 224 : index
    %87 = vector.load %arg17[%c0_86, %c224] : memref<2x392xf32, #tpu.memory_space<vmem>>, vector<1x56xf32>
    tpu.vector_store %arg17[%c0_86, %c224], %86 {strides = array<i32>} : memref<2x392xf32, #tpu.memory_space<vmem>>, vector<1x56xf32>,
    %88 = vector.extract_strided_slice %77 {offsets = [5, 0], sizes = [1, 56], strides = [1, 1]} : vector<7x56xf32> to vector<1x56xf32>
    %c0_87 = arith.constant 0 : index
    %c280 = arith.constant 280 : index
    %89 = vector.load %arg17[%c0_87, %c280] : memref<2x392xf32, #tpu.memory_space<vmem>>, vector<1x56xf32>
    tpu.vector_store %arg17[%c0_87, %c280], %88 {strides = array<i32>} : memref<2x392xf32, #tpu.memory_space<vmem>>, vector<1x56xf32>,
    %90 = vector.extract_strided_slice %77 {offsets = [6, 0], sizes = [1, 56], strides = [1, 1]} : vector<7x56xf32> to vector<1x56xf32>
    %c0_88 = arith.constant 0 : index
    %c336 = arith.constant 336 : index
    %91 = vector.load %arg17[%c0_88, %c336] : memref<2x392xf32, #tpu.memory_space<vmem>>, vector<1x56xf32>
    tpu.vector_store %arg17[%c0_88, %c336], %90 {strides = array<i32>} : memref<2x392xf32, #tpu.memory_space<vmem>>, vector<1x56xf32>,
    %c1_89 = arith.constant 1 : index
    %c0_90 = arith.constant 0 : index
    %c0_91 = arith.constant 0 : index
    %92 = vector.load %arg0[%c1_89, %c0_90, %c0_91] : memref<2x30x30xf32, #tpu.memory_space<vmem>>, vector<1x28x30xf32>
    %93 = vector.shape_cast %92 : vector<1x28x30xf32> to vector<28x30xf32>
    %c0_92 = arith.constant 0 : index
    %c0_93 = arith.constant 0 : index
    %c0_94 = arith.constant 0 : index
    %94 = vector.load %arg1[%c0_92, %c0_93, %c0_94] : memref<3x30x56xf32, #tpu.memory_space<vmem>>, vector<1x30x56xf32>
    %95 = vector.shape_cast %94 : vector<1x30x56xf32> to vector<30x56xf32>
    %cst_95 = arith.constant dense<0.000000e+00> : vector<28x56xf32>
    %96 = tpu.matmul %93, %95, %cst_95 {dimension_numbers = #tpu.dot_dimension_numbers<[1], [0], [0], [1], [0, 0, 1, 1], [], []>} : vector<28x30xf32>, vector<30x56xf32>, vector<28x56xf32> -> vector<28x56xf32>
    %c0_96 = arith.constant 0 : index
    %c0_97 = arith.constant 0 : index
    %c0_98 = arith.constant 0 : index
    %97 = vector.load %arg2[%c0_96, %c0_97, %c0_98] : memref<3x30x56xf32, #tpu.memory_space<vmem>>, vector<1x30x56xf32>
    %98 = vector.shape_cast %97 : vector<1x30x56xf32> to vector<30x56xf32>
    %cst_99 = arith.constant dense<0.000000e+00> : vector<28x56xf32>
    %99 = tpu.matmul %93, %98, %cst_99 {dimension_numbers = #tpu.dot_dimension_numbers<[1], [0], [0], [1], [0, 0, 1, 1], [], []>} : vector<28x30xf32>, vector<30x56xf32>, vector<28x56xf32> -> vector<28x56xf32>
    %c1_100 = arith.constant 1 : index
    %c1_101 = arith.constant 1 : index
    %c0_102 = arith.constant 0 : index
    %100 = vector.load %arg0[%c1_100, %c1_101, %c0_102] : memref<2x30x30xf32, #tpu.memory_space<vmem>>, vector<1x28x30xf32>
    %101 = vector.shape_cast %100 : vector<1x28x30xf32> to vector<28x30xf32>
    %c1_103 = arith.constant 1 : index
    %c0_104 = arith.constant 0 : index
    %c0_105 = arith.constant 0 : index
    %102 = vector.load %arg1[%c1_103, %c0_104, %c0_105] : memref<3x30x56xf32, #tpu.memory_space<vmem>>, vector<1x30x56xf32>
    %103 = vector.shape_cast %102 : vector<1x30x56xf32> to vector<30x56xf32>
    %cst_106 = arith.constant dense<0.000000e+00> : vector<28x56xf32>
    %104 = tpu.matmul %101, %103, %cst_106 {dimension_numbers = #tpu.dot_dimension_numbers<[1], [0], [0], [1], [0, 0, 1, 1], [], []>} : vector<28x30xf32>, vector<30x56xf32>, vector<28x56xf32> -> vector<28x56xf32>
    %c1_107 = arith.constant 1 : index
    %c0_108 = arith.constant 0 : index
    %c0_109 = arith.constant 0 : index
    %105 = vector.load %arg2[%c1_107, %c0_108, %c0_109] : memref<3x30x56xf32, #tpu.memory_space<vmem>>, vector<1x30x56xf32>
    %106 = vector.shape_cast %105 : vector<1x30x56xf32> to vector<30x56xf32>
    %cst_110 = arith.constant dense<0.000000e+00> : vector<28x56xf32>
    %107 = tpu.matmul %101, %106, %cst_110 {dimension_numbers = #tpu.dot_dimension_numbers<[1], [0], [0], [1], [0, 0, 1, 1], [], []>} : vector<28x30xf32>, vector<30x56xf32>, vector<28x56xf32> -> vector<28x56xf32>
    %108 = arith.addf %96, %104 : vector<28x56xf32>
    %109 = arith.addf %99, %107 : vector<28x56xf32>
    %c1_111 = arith.constant 1 : index
    %c2_112 = arith.constant 2 : index
    %c0_113 = arith.constant 0 : index
    %110 = vector.load %arg0[%c1_111, %c2_112, %c0_113] : memref<2x30x30xf32, #tpu.memory_space<vmem>>, vector<1x28x30xf32>
    %111 = vector.shape_cast %110 : vector<1x28x30xf32> to vector<28x30xf32>
    %c2_114 = arith.constant 2 : index
    %c0_115 = arith.constant 0 : index
    %c0_116 = arith.constant 0 : index
    %112 = vector.load %arg1[%c2_114, %c0_115, %c0_116] : memref<3x30x56xf32, #tpu.memory_space<vmem>>, vector<1x30x56xf32>
    %113 = vector.shape_cast %112 : vector<1x30x56xf32> to vector<30x56xf32>
    %cst_117 = arith.constant dense<0.000000e+00> : vector<28x56xf32>
    %114 = tpu.matmul %111, %113, %cst_117 {dimension_numbers = #tpu.dot_dimension_numbers<[1], [0], [0], [1], [0, 0, 1, 1], [], []>} : vector<28x30xf32>, vector<30x56xf32>, vector<28x56xf32> -> vector<28x56xf32>
    %c2_118 = arith.constant 2 : index
    %c0_119 = arith.constant 0 : index
    %c0_120 = arith.constant 0 : index
    %115 = vector.load %arg2[%c2_118, %c0_119, %c0_120] : memref<3x30x56xf32, #tpu.memory_space<vmem>>, vector<1x30x56xf32>
    %116 = vector.shape_cast %115 : vector<1x30x56xf32> to vector<30x56xf32>
    %cst_121 = arith.constant dense<0.000000e+00> : vector<28x56xf32>
    %117 = tpu.matmul %111, %116, %cst_121 {dimension_numbers = #tpu.dot_dimension_numbers<[1], [0], [0], [1], [0, 0, 1, 1], [], []>} : vector<28x30xf32>, vector<30x56xf32>, vector<28x56xf32> -> vector<28x56xf32>
    %118 = arith.addf %108, %114 : vector<28x56xf32>
    %119 = arith.addf %109, %117 : vector<28x56xf32>
    %120 = arith.maximumf %118, %119 : vector<28x56xf32>
    %c0_122 = arith.constant 0 : index
    %c0_123 = arith.constant 0 : index
    %121 = vector.load %arg5[%c0_122, %c0_123] : memref<1x56xf32, #tpu.memory_space<vmem>>, vector<1x56xf32>
    %122 = vector.broadcast %121 : vector<1x56xf32> to vector<28x56xf32>
    %123 = arith.addf %120, %122 : vector<28x56xf32>
    %cst_124 = arith.constant 0.000000e+00 : f32
    %124 = vector.broadcast %cst_124 : f32 to vector<28x56xf32>
    %125 = arith.maximumf %123, %124 : vector<28x56xf32>
    %c0_125 = arith.constant 0 : index
    %c0_126 = arith.constant 0 : index
    %126 = vector.load %arg3[%c0_125, %c0_126] : memref<14x28xf32, #tpu.memory_space<vmem>>, vector<14x28xf32>
    %cst_127 = arith.constant dense<0.000000e+00> : vector<14x56xf32>
    %127 = tpu.matmul %126, %125, %cst_127 {dimension_numbers = #tpu.dot_dimension_numbers<[1], [0], [0], [1], [0, 0, 1, 1], [], []>} : vector<14x28xf32>, vector<28x56xf32>, vector<14x56xf32> -> vector<14x56xf32>
    %c0_128 = arith.constant 0 : index
    %c0_129 = arith.constant 0 : index
    %128 = vector.load %arg4[%c0_128, %c0_129] : memref<14x28xf32, #tpu.memory_space<vmem>>, vector<14x28xf32>
    %cst_130 = arith.constant dense<0.000000e+00> : vector<14x56xf32>
    %129 = tpu.matmul %128, %125, %cst_130 {dimension_numbers = #tpu.dot_dimension_numbers<[1], [0], [0], [1], [0, 0, 1, 1], [], []>} : vector<14x28xf32>, vector<28x56xf32>, vector<14x56xf32> -> vector<14x56xf32>
    %130 = arith.maximumf %127, %129 : vector<14x56xf32>
    %c1_131 = arith.constant 1 : index
    %c4_132 = arith.constant 4 : index
    %131 = vector.load %arg16[%c1_131, %c4_132] : memref<16x64xf32, #tpu.memory_space<vmem>>, vector<14x56xf32>
    tpu.vector_store %arg16[%c1_131, %c4_132], %130 {strides = array<i32>} : memref<16x64xf32, #tpu.memory_space<vmem>>, vector<14x56xf32>,
    %c0_133 = arith.constant 0 : index
    %c0_134 = arith.constant 0 : index
    %132 = vector.load %arg16[%c0_133, %c0_134] : memref<16x64xf32, #tpu.memory_space<vmem>>, vector<14x64xf32>
    %c0_135 = arith.constant 0 : index
    %c0_136 = arith.constant 0 : index
    %c0_137 = arith.constant 0 : index
    %133 = vector.load %arg6[%c0_135, %c0_136, %c0_137] : memref<3x64x56xf32, #tpu.memory_space<vmem>>, vector<1x64x56xf32>
    %134 = vector.shape_cast %133 : vector<1x64x56xf32> to vector<64x56xf32>
    %cst_138 = arith.constant dense<0.000000e+00> : vector<14x56xf32>
    %135 = tpu.matmul %132, %134, %cst_138 {dimension_numbers = #tpu.dot_dimension_numbers<[1], [0], [0], [1], [0, 0, 1, 1], [], []>} : vector<14x64xf32>, vector<64x56xf32>, vector<14x56xf32> -> vector<14x56xf32>
    %c0_139 = arith.constant 0 : index
    %c0_140 = arith.constant 0 : index
    %c0_141 = arith.constant 0 : index
    %136 = vector.load %arg7[%c0_139, %c0_140, %c0_141] : memref<3x64x56xf32, #tpu.memory_space<vmem>>, vector<1x64x56xf32>
    %137 = vector.shape_cast %136 : vector<1x64x56xf32> to vector<64x56xf32>
    %cst_142 = arith.constant dense<0.000000e+00> : vector<14x56xf32>
    %138 = tpu.matmul %132, %137, %cst_142 {dimension_numbers = #tpu.dot_dimension_numbers<[1], [0], [0], [1], [0, 0, 1, 1], [], []>} : vector<14x64xf32>, vector<64x56xf32>, vector<14x56xf32> -> vector<14x56xf32>
    %c1_143 = arith.constant 1 : index
    %c0_144 = arith.constant 0 : index
    %139 = vector.load %arg16[%c1_143, %c0_144] : memref<16x64xf32, #tpu.memory_space<vmem>>, vector<14x64xf32>
    %c1_145 = arith.constant 1 : index
    %c0_146 = arith.constant 0 : index
    %c0_147 = arith.constant 0 : index
    %140 = vector.load %arg6[%c1_145, %c0_146, %c0_147] : memref<3x64x56xf32, #tpu.memory_space<vmem>>, vector<1x64x56xf32>
    %141 = vector.shape_cast %140 : vector<1x64x56xf32> to vector<64x56xf32>
    %cst_148 = arith.constant dense<0.000000e+00> : vector<14x56xf32>
    %142 = tpu.matmul %139, %141, %cst_148 {dimension_numbers = #tpu.dot_dimension_numbers<[1], [0], [0], [1], [0, 0, 1, 1], [], []>} : vector<14x64xf32>, vector<64x56xf32>, vector<14x56xf32> -> vector<14x56xf32>
    %c1_149 = arith.constant 1 : index
    %c0_150 = arith.constant 0 : index
    %c0_151 = arith.constant 0 : index
    %143 = vector.load %arg7[%c1_149, %c0_150, %c0_151] : memref<3x64x56xf32, #tpu.memory_space<vmem>>, vector<1x64x56xf32>
    %144 = vector.shape_cast %143 : vector<1x64x56xf32> to vector<64x56xf32>
    %cst_152 = arith.constant dense<0.000000e+00> : vector<14x56xf32>
    %145 = tpu.matmul %139, %144, %cst_152 {dimension_numbers = #tpu.dot_dimension_numbers<[1], [0], [0], [1], [0, 0, 1, 1], [], []>} : vector<14x64xf32>, vector<64x56xf32>, vector<14x56xf32> -> vector<14x56xf32>
    %146 = arith.addf %135, %142 : vector<14x56xf32>
    %147 = arith.addf %138, %145 : vector<14x56xf32>
    %c2_153 = arith.constant 2 : index
    %c0_154 = arith.constant 0 : index
    %148 = vector.load %arg16[%c2_153, %c0_154] : memref<16x64xf32, #tpu.memory_space<vmem>>, vector<14x64xf32>
    %c2_155 = arith.constant 2 : index
    %c0_156 = arith.constant 0 : index
    %c0_157 = arith.constant 0 : index
    %149 = vector.load %arg6[%c2_155, %c0_156, %c0_157] : memref<3x64x56xf32, #tpu.memory_space<vmem>>, vector<1x64x56xf32>
    %150 = vector.shape_cast %149 : vector<1x64x56xf32> to vector<64x56xf32>
    %cst_158 = arith.constant dense<0.000000e+00> : vector<14x56xf32>
    %151 = tpu.matmul %148, %150, %cst_158 {dimension_numbers = #tpu.dot_dimension_numbers<[1], [0], [0], [1], [0, 0, 1, 1], [], []>} : vector<14x64xf32>, vector<64x56xf32>, vector<14x56xf32> -> vector<14x56xf32>
    %c2_159 = arith.constant 2 : index
    %c0_160 = arith.constant 0 : index
    %c0_161 = arith.constant 0 : index
    %152 = vector.load %arg7[%c2_159, %c0_160, %c0_161] : memref<3x64x56xf32, #tpu.memory_space<vmem>>, vector<1x64x56xf32>
    %153 = vector.shape_cast %152 : vector<1x64x56xf32> to vector<64x56xf32>
    %cst_162 = arith.constant dense<0.000000e+00> : vector<14x56xf32>
    %154 = tpu.matmul %148, %153, %cst_162 {dimension_numbers = #tpu.dot_dimension_numbers<[1], [0], [0], [1], [0, 0, 1, 1], [], []>} : vector<14x64xf32>, vector<64x56xf32>, vector<14x56xf32> -> vector<14x56xf32>
    %155 = arith.addf %146, %151 : vector<14x56xf32>
    %156 = arith.addf %147, %154 : vector<14x56xf32>
    %157 = arith.maximumf %155, %156 : vector<14x56xf32>
    %c0_163 = arith.constant 0 : index
    %c0_164 = arith.constant 0 : index
    %158 = vector.load %arg10[%c0_163, %c0_164] : memref<1x56xf32, #tpu.memory_space<vmem>>, vector<1x56xf32>
    %159 = vector.broadcast %158 : vector<1x56xf32> to vector<14x56xf32>
    %160 = arith.addf %157, %159 : vector<14x56xf32>
    %cst_165 = arith.constant 0.000000e+00 : f32
    %161 = vector.broadcast %cst_165 : f32 to vector<14x56xf32>
    %162 = arith.maximumf %160, %161 : vector<14x56xf32>
    %c0_166 = arith.constant 0 : index
    %c0_167 = arith.constant 0 : index
    %163 = vector.load %arg8[%c0_166, %c0_167] : memref<7x14xf32, #tpu.memory_space<vmem>>, vector<7x14xf32>
    %cst_168 = arith.constant dense<0.000000e+00> : vector<7x56xf32>
    %164 = tpu.matmul %163, %162, %cst_168 {dimension_numbers = #tpu.dot_dimension_numbers<[1], [0], [0], [1], [0, 0, 1, 1], [], []>} : vector<7x14xf32>, vector<14x56xf32>, vector<7x56xf32> -> vector<7x56xf32>
    %c0_169 = arith.constant 0 : index
    %c0_170 = arith.constant 0 : index
    %165 = vector.load %arg9[%c0_169, %c0_170] : memref<7x14xf32, #tpu.memory_space<vmem>>, vector<7x14xf32>
    %cst_171 = arith.constant dense<0.000000e+00> : vector<7x56xf32>
    %166 = tpu.matmul %165, %162, %cst_171 {dimension_numbers = #tpu.dot_dimension_numbers<[1], [0], [0], [1], [0, 0, 1, 1], [], []>} : vector<7x14xf32>, vector<14x56xf32>, vector<7x56xf32> -> vector<7x56xf32>
    %167 = arith.maximumf %164, %166 : vector<7x56xf32>
    %168 = vector.extract_strided_slice %167 {offsets = [0, 0], sizes = [1, 56], strides = [1, 1]} : vector<7x56xf32> to vector<1x56xf32>
    %c1_172 = arith.constant 1 : index
    %c0_173 = arith.constant 0 : index
    %169 = vector.load %arg17[%c1_172, %c0_173] : memref<2x392xf32, #tpu.memory_space<vmem>>, vector<1x56xf32>
    tpu.vector_store %arg17[%c1_172, %c0_173], %168 {strides = array<i32>} : memref<2x392xf32, #tpu.memory_space<vmem>>, vector<1x56xf32>,
    %170 = vector.extract_strided_slice %167 {offsets = [1, 0], sizes = [1, 56], strides = [1, 1]} : vector<7x56xf32> to vector<1x56xf32>
    %c1_174 = arith.constant 1 : index
    %c56_175 = arith.constant 56 : index
    %171 = vector.load %arg17[%c1_174, %c56_175] : memref<2x392xf32, #tpu.memory_space<vmem>>, vector<1x56xf32>
    tpu.vector_store %arg17[%c1_174, %c56_175], %170 {strides = array<i32>} : memref<2x392xf32, #tpu.memory_space<vmem>>, vector<1x56xf32>,
    %172 = vector.extract_strided_slice %167 {offsets = [2, 0], sizes = [1, 56], strides = [1, 1]} : vector<7x56xf32> to vector<1x56xf32>
    %c1_176 = arith.constant 1 : index
    %c112_177 = arith.constant 112 : index
    %173 = vector.load %arg17[%c1_176, %c112_177] : memref<2x392xf32, #tpu.memory_space<vmem>>, vector<1x56xf32>
    tpu.vector_store %arg17[%c1_176, %c112_177], %172 {strides = array<i32>} : memref<2x392xf32, #tpu.memory_space<vmem>>, vector<1x56xf32>,
    %174 = vector.extract_strided_slice %167 {offsets = [3, 0], sizes = [1, 56], strides = [1, 1]} : vector<7x56xf32> to vector<1x56xf32>
    %c1_178 = arith.constant 1 : index
    %c168_179 = arith.constant 168 : index
    %175 = vector.load %arg17[%c1_178, %c168_179] : memref<2x392xf32, #tpu.memory_space<vmem>>, vector<1x56xf32>
    tpu.vector_store %arg17[%c1_178, %c168_179], %174 {strides = array<i32>} : memref<2x392xf32, #tpu.memory_space<vmem>>, vector<1x56xf32>,
    %176 = vector.extract_strided_slice %167 {offsets = [4, 0], sizes = [1, 56], strides = [1, 1]} : vector<7x56xf32> to vector<1x56xf32>
    %c1_180 = arith.constant 1 : index
    %c224_181 = arith.constant 224 : index
    %177 = vector.load %arg17[%c1_180, %c224_181] : memref<2x392xf32, #tpu.memory_space<vmem>>, vector<1x56xf32>
    tpu.vector_store %arg17[%c1_180, %c224_181], %176 {strides = array<i32>} : memref<2x392xf32, #tpu.memory_space<vmem>>, vector<1x56xf32>,
    %178 = vector.extract_strided_slice %167 {offsets = [5, 0], sizes = [1, 56], strides = [1, 1]} : vector<7x56xf32> to vector<1x56xf32>
    %c1_182 = arith.constant 1 : index
    %c280_183 = arith.constant 280 : index
    %179 = vector.load %arg17[%c1_182, %c280_183] : memref<2x392xf32, #tpu.memory_space<vmem>>, vector<1x56xf32>
    tpu.vector_store %arg17[%c1_182, %c280_183], %178 {strides = array<i32>} : memref<2x392xf32, #tpu.memory_space<vmem>>, vector<1x56xf32>,
    %180 = vector.extract_strided_slice %167 {offsets = [6, 0], sizes = [1, 56], strides = [1, 1]} : vector<7x56xf32> to vector<1x56xf32>
    %c1_184 = arith.constant 1 : index
    %c336_185 = arith.constant 336 : index
    %181 = vector.load %arg17[%c1_184, %c336_185] : memref<2x392xf32, #tpu.memory_space<vmem>>, vector<1x56xf32>
    tpu.vector_store %arg17[%c1_184, %c336_185], %180 {strides = array<i32>} : memref<2x392xf32, #tpu.memory_space<vmem>>, vector<1x56xf32>,
    %c0_186 = arith.constant 0 : index
    %c0_187 = arith.constant 0 : index
    %182 = vector.load %arg17[%c0_186, %c0_187] : memref<2x392xf32, #tpu.memory_space<vmem>>, vector<2x392xf32>
    %c0_188 = arith.constant 0 : index
    %c0_189 = arith.constant 0 : index
    %183 = vector.load %arg11[%c0_188, %c0_189] : memref<392x100xf32, #tpu.memory_space<vmem>>, vector<392x100xf32>
    %cst_190 = arith.constant dense<0.000000e+00> : vector<2x100xf32>
    %184 = tpu.matmul %182, %183, %cst_190 {dimension_numbers = #tpu.dot_dimension_numbers<[1], [0], [0], [1], [0, 0, 1, 1], [], []>} : vector<2x392xf32>, vector<392x100xf32>, vector<2x100xf32> -> vector<2x100xf32>
    %c0_191 = arith.constant 0 : index
    %c0_192 = arith.constant 0 : index
    %185 = vector.load %arg12[%c0_191, %c0_192] : memref<1x100xf32, #tpu.memory_space<vmem>>, vector<1x100xf32>
    %186 = vector.broadcast %185 : vector<1x100xf32> to vector<2x100xf32>
    %187 = arith.addf %184, %186 : vector<2x100xf32>
    %cst_193 = arith.constant 0.000000e+00 : f32
    %188 = vector.broadcast %cst_193 : f32 to vector<2x100xf32>
    %189 = arith.maximumf %187, %188 : vector<2x100xf32>
    %c0_194 = arith.constant 0 : index
    %c0_195 = arith.constant 0 : index
    %190 = vector.load %arg13[%c0_194, %c0_195] : memref<100x10xf32, #tpu.memory_space<vmem>>, vector<100x10xf32>
    %cst_196 = arith.constant dense<0.000000e+00> : vector<2x10xf32>
    %191 = tpu.matmul %189, %190, %cst_196 {dimension_numbers = #tpu.dot_dimension_numbers<[1], [0], [0], [1], [0, 0, 1, 1], [], []>} : vector<2x100xf32>, vector<100x10xf32>, vector<2x10xf32> -> vector<2x10xf32>
    %c0_197 = arith.constant 0 : index
    %c0_198 = arith.constant 0 : index
    %192 = vector.load %arg14[%c0_197, %c0_198] : memref<1x10xf32, #tpu.memory_space<vmem>>, vector<1x10xf32>
    %193 = vector.broadcast %192 : vector<1x10xf32> to vector<2x10xf32>
    %194 = arith.addf %191, %193 : vector<2x10xf32>
    %cst_199 = arith.constant dense<0xFF800000> : vector<2xf32>
    %195 = vector.multi_reduction <maximumf>, %194, %cst_199 [1] : vector<2x10xf32> to vector<2xf32>
    %196 = vector.shape_cast %195 : vector<2xf32> to vector<2x1xf32>
    %197 = vector.broadcast %196 : vector<2x1xf32> to vector<2x10xf32>
    %198 = arith.subf %194, %197 : vector<2x10xf32>
    %199 = math.exp %198 : vector<2x10xf32>
    %cst_200 = arith.constant dense<0.000000e+00> : vector<2xf32>
    %200 = vector.multi_reduction <add>, %199, %cst_200 [1] : vector<2x10xf32> to vector<2xf32>
    %201 = vector.shape_cast %200 : vector<2xf32> to vector<2x1xf32>
    %202 = math.log %201 : vector<2x1xf32>
    %203 = vector.broadcast %202 : vector<2x1xf32> to vector<2x10xf32>
    %204 = arith.subf %198, %203 : vector<2x10xf32>
    %c0_201 = arith.constant 0 : index
    %c0_202 = arith.constant 0 : index
    %205 = vector.load %arg15[%c0_201, %c0_202] : memref<2x10xf32, #tpu.memory_space<vmem>>, vector<2x10xf32>
    tpu.vector_store %arg15[%c0_201, %c0_202], %204 {strides = array<i32>} : memref<2x10xf32, #tpu.memory_space<vmem>>, vector<2x10xf32>,
    return
  }
}

</mosaic_0001>

<bundles_post_ra>
// kernel: mnist_forward.1
= control target key start
LH: loop header
LB: loop body
LE: loop exit
PB: predicated region body
PF: predicated region fallthrough
CT: control target
= control target key end

     0   :  { %vm88_vm0 = vcmask 1045504   ;;  %vm75_vm1 = vcmask 244736   ;;  %s3056_s0 = inlined_call_operand.vmem [shape: f32[2,30,30], index: 0, kind: input, shape index: {}]   ;;  %s3057_s1 = inlined_call_operand.vmem [shape: f32[3,30,56], index: 1, kind: input, shape index: {}]   ;;  %s3058_s2 = inlined_call_operand.vmem [shape: f32[3,30,56], index: 2, kind: input, shape index: {}]   ;;  %s3059_s3 = inlined_call_operand.vmem [shape: f32[14,28], index: 3, kind: input, shape index: {}]   ;;  %s3060_s4 = inlined_call_operand.vmem [shape: f32[14,28], index: 4, kind: input, shape index: {}]   ;;  %s3061_s5 = inlined_call_operand.vmem [shape: f32[1,56], index: 5, kind: input, shape index: {}]   ;;  %s3062_s6 = inlined_call_operand.vmem [shape: f32[3,64,56], index: 6, kind: input, shape index: {}]   ;;  %s3063_s7 = inlined_call_operand.vmem [shape: f32[3,64,56], index: 7, kind: input, shape index: {}]   ;;  %s3064_s8 = inlined_call_operand.vmem [shape: f32[7,14], index: 8, kind: input, shape index: {}]   ;;  %s3065_s9 = inlined_call_operand.vmem [shape: f32[7,14], index: 9, kind: input, shape index: {}]   ;;  %s3066_s10 = inlined_call_operand.vmem [shape: f32[1,56], index: 10, kind: input, shape index: {}]   ;;  %s3067_s11 = inlined_call_operand.vmem [shape: f32[392,100], index: 11, kind: input, shape index: {}]   ;;  %s3068_s12 = inlined_call_operand.vmem [shape: f32[1,100], index: 12, kind: input, shape index: {}]   ;;  %s3069_s13 = inlined_call_operand.vmem [shape: f32[100,10], index: 13, kind: input, shape index: {}]   ;;  %s3070_s14 = inlined_call_operand.vmem [shape: f32[1,10], index: 14, kind: input, shape index: {}]   ;;  %s3071_s15 = inlined_call_operand.hbm [shape: f32[2,10], index: 15, kind: output, shape index: {}]  }
   0x1   :  { %v1698_v0 = vld [vmem:[%s3057_s1 + $0x38] sm:$0x3f]  ;;  %v2067_v2 = vld [vmem:[%s3057_s1 + $0x30] sm:$0xff]  ;;  %v2097_v8 = vld [vmem:[%s3057_s1 + $0x28] sm:$0xff] }
   0x2   :  { %v1707_v1 = vld [vmem:[%s3058_s2 + $0x38] sm:$0x3f]  ;;  %1699 = vmatpush.msk.msra.mxu0 %vm88_vm0, %v1698_v0  ;;  %v2080_v5 = vld [vmem:[%s3058_s2 + $0x30] sm:$0xff]  ;;  %v2104_v9 = vld [vmem:[%s3058_s2 + $0x28] sm:$0xff] }
   0x3   :  { %1708 = vmatpush.msk.msra.mxu1 %vm88_vm0, %v1707_v1  ;;  %v61_v3 = vld [vmem:[%s3057_s1 + $0x18] sm:$0x3f]  ;;  %v2087_v6 = vld [vmem:[%s3057_s1 + $0x10] sm:$0xff]  ;;  %v2109_v10 = vld [vmem:[%s3057_s1 + $0x8] sm:$0xff] }
   0x4   :  { %v65_v4 = vld [vmem:[%s3058_s2 + $0x18] sm:$0x3f]  ;;  %1713 = vmatpush.msk.msra.mxu2 %vm88_vm0, %v61_v3  ;;  %v2092_v7 = vld [vmem:[%s3058_s2 + $0x10] sm:$0xff]  ;;  %105 = vmatpush.msra.mxu0 %v2067_v2  ;;  %v2114_v11 = vld [vmem:[%s3058_s2 + $0x8] sm:$0xff] }
   0x5   :  { %1718 = vmatpush.msk.msra.mxu3 %vm88_vm0, %v65_v4  ;;  %142 = vmatpush.msra.mxu1 %v2080_v5  ;;  %v2121_v12 = vld [vmem:[%s3057_s1 + $0x20] sm:$0xff]  ;;  %v1726_v18 = vld [vmem:[%s3057_s1 + $0x58] sm:$0x3f]  ;;  %v2165_v20 = vld [vmem:[%s3057_s1 + $0x50] sm:$0xff] }
   0x6   :  { %186 = vmatpush.msra.mxu2 %v2087_v6  ;;  %v2126_v13 = vld [vmem:[%s3058_s2 + $0x20] sm:$0xff]  ;;  %106 = vmatpush.msra.mxu0 %v2097_v8  ;;  %v1735_v19 = vld [vmem:[%s3058_s2 + $0x58] sm:$0x3f]  ;;  %v2170_v21 = vld [vmem:[%s3058_s2 + $0x50] sm:$0xff] }
   0x7   :  { %218 = vmatpush.msra.mxu3 %v2092_v7  ;;  %143 = vmatpush.msra.mxu1 %v2104_v9  ;;  %v2133_v14 = vld [vmem:[%s3057_s1] sm:$0xff]  ;;  %v2175_v22 = vld [vmem:[%s3057_s1 + $0x48] sm:$0xff] }
   0x8   :  { %v2138_v15 = vld [vmem:[%s3058_s2] sm:$0xff]  ;;  %187 = vmatpush.msra.mxu2 %v2109_v10  ;;  %107 = vmatpush.msra.mxu0 %v2121_v12  ;;  %v2182_v23 = vld [vmem:[%s3058_s2 + $0x48] sm:$0xff] }
   0x9   :  { %219 = vmatpush.msra.mxu3 %v2114_v11  ;;  %v66_v16 = vld [vmem:[%s3056_s0 + $0x1] sm:$0xff]  ;;  %144 = vmatpush.msra.mxu1 %v2126_v13 }
   0xa   :  { %v54_v17 = vld [vmem:[%s3056_s0] sm:$0xff]  ;;  %188 = vmatpush.msra.mxu2 %v2133_v14  ;;  %1700 = vmatmul.msk.f32.vlgmr.msra.gmra.mxu0 %vm75_vm1, %v66_v16 }
   0xb   :  { %220 = vmatpush.msra.mxu3 %v2138_v15  ;;  %1709 = vmatmul.msk.f32.vlgmr.msra.gmra.mxu1 %vm75_vm1, %v66_v16 }
   0xc   :  { %1714 = vmatmul.msk.f32.vlgmr.msra.gmra.mxu2 %vm75_vm1, %v54_v17  ;;  %1719 = vmatmul.msk.f32.vlgmr.msra.gmra.mxu3 %vm75_vm1, %v54_v17 }
   0xd   :  { %1727 = vmatpush.msk.msrb.mxu0 %vm88_vm0, %v1726_v18  ;;  %1736 = vmatpush.msk.msrb.mxu1 %vm88_vm0, %v1735_v19 }
   0xf   :  { %271 = vmatpush.msrb.mxu0 %v2165_v20  ;;  %308 = vmatpush.msrb.mxu1 %v2170_v21 }
  0x10   :  { %20 = vsyncpa [#allocation5], 0  ;;  %v67_v24 = vld [vmem:[%s3056_s0 + $0x9] sm:$0xff]  ;;  %v2197_v26 = vld [vmem:[%s3057_s1 + $0x40] sm:$0xff]  ;;  %vm357_vm2 = vcmask 1043456   ;;  %vm350_vm3 = vcmask 228352  }
  0x11   :  { %v55_v25 = vld [vmem:[%s3056_s0 + $0x8] sm:$0xff]  ;;  %272 = vmatpush.msrb.mxu0 %v2175_v22  ;;  %309 = vmatpush.msrb.mxu1 %v2182_v23  ;;  %v2202_v27 = vld [vmem:[%s3058_s2 + $0x40] sm:$0xff]  ;;  %v68_v28 = vld [vmem:[%s3056_s0 + $0x11] sm:$0xff]  ;;  %s1969_s27 = smov 4   ;;  %vm51_vm4 = vcmask 523264   ;;  %vm425_vm5 = vcmask 490528  }
  0x12   :  { %1701 = vmatmul.msk.f32.gmra.mxu0 %vm75_vm1, %v67_v24  ;;  %v56_v29 = vld [vmem:[%s3056_s0 + $0x10] sm:$0xff]  ;;  %v69_v30 = vld [vmem:[%s3056_s0 + $0x19] sm:$0xf]  ;;  %v234_v32 = vld [vmem:[%s3056_s0 + $0x2] sm:$0xff]  ;;  %vm427_vm6 = vcmask 488480   ;;  %vm658_vm7 = vcmask 113664  }
  0x13   :  { %1710 = vmatmul.msk.f32.gmra.mxu1 %vm75_vm1, %v67_v24  ;;  %273 = vmatpush.msrb.mxu0 %v2197_v26  ;;  %v57_v31 = vld [vmem:[%s3056_s0 + $0x18] sm:$0xf]  ;;  %v235_v33 = vld [vmem:[%s3056_s0 + $0xa] sm:$0xff]  ;;  %vm710_vm8 = vcmask 450560   ;;  %s1972_s28 = smov 112   ;;  %s1973_s16 = smov 80  }
  0x14   :  { %1715 = vmatmul.msk.f32.gmra.mxu2 %vm75_vm1, %v55_v25  ;;  %1720 = vmatmul.msk.f32.gmra.mxu3 %vm75_vm1, %v55_v25  ;;  %v236_v34 = vld [vmem:[%s3056_s0 + $0x12] sm:$0xff]  ;;  %v237_v35 = vld [vmem:[%s3056_s0 + $0x1a] sm:$0xf]  ;;  %vm729_vm9 = vcmask 1041280   ;;  %vm730_vm10 = vcmask 321538   ;;  %vm726_vm11 = vcmask 916480  }
  0x15   :  { %310 = vmatpush.msrb.mxu1 %v2202_v27  ;;  %vm718_vm12 = vcmask 909760   ;;  %vm2781_vm13 = vmor %vm730_vm10, %vm729_vm9  ;;  %vm752_vm14 = vcmask 1041152   ;;  %vm753_vm15 = vcmask 190466   ;;  %vm1638_vm9 = vcmask 818176  }
  0x16   :  { %vm1665_vm10 = vcmask 74752  }
  0x1a   :  { %1702 = vmatmul.msk.f32.gmra.mxu0 %vm75_vm1, %v68_v28 }
  0x1b   :  { %1711 = vmatmul.msk.f32.gmra.mxu1 %vm75_vm1, %v68_v28 }
  0x1c   :  { %1716 = vmatmul.msk.f32.gmra.mxu2 %vm75_vm1, %v56_v29  ;;  %1721 = vmatmul.msk.f32.gmra.mxu3 %vm75_vm1, %v56_v29 }
  0x22   :  { %1703 = vmatmul.msk.f32.gmra.mxu0 %vm75_vm1, %v69_v30 }
  0x23   :  { %1712 = vmatmul.msk.f32.gmra.mxu1 %vm75_vm1, %v69_v30 }
  0x24   :  { %1717 = vmatmul.msk.f32.gmra.mxu2 %vm75_vm1, %v57_v31  ;;  %1722 = vmatmul.msk.f32.gmra.mxu3 %vm75_vm1, %v57_v31 }
  0x2a   :  { %1728 = vmatmul.msk.f32.vlgmr.msrb.gmra.mxu0 %vm75_vm1, %v234_v32 }
  0x2b   :  { %1737 = vmatmul.msk.f32.vlgmr.msrb.gmra.mxu1 %vm75_vm1, %v234_v32 }
  0x32   :  { %1729 = vmatmul.msk.f32.gmra.mxu0 %vm75_vm1, %v235_v33 }
  0x33   :  { %1738 = vmatmul.msk.f32.gmra.mxu1 %vm75_vm1, %v235_v33  ;;  %v1933_v33 = vld [vmem:[%s3061_s5] ss:$0 sm:$0xff] }
  0x3a   :  { %1730 = vmatmul.msk.f32.gmra.mxu0 %vm75_vm1, %v236_v34 }
  0x3b   :  { %1739 = vmatmul.msk.f32.gmra.mxu1 %vm75_vm1, %v236_v34 }
  0x42   :  { %1731 = vmatmul.msk.f32.gmra.mxu0 %vm75_vm1, %v237_v35 }
  0x43   :  { %1740 = vmatmul.msk.f32.gmra.mxu1 %vm75_vm1, %v237_v35 }
  0x87   :  { %v109_v36 = vpop.f32.mrf.mxu0 }
  0x88   :  { %v146_v37 = vpop.f32.mrf.mxu1 }
  0x8f   :  { %v112_v38 = vpop.f32.mrf.mxu0  ;;  %v190_v42 = vpop.f32.mrf.mxu2 }
  0x90   :  { %v149_v39 = vpop.f32.mrf.mxu1  ;;  %v222_v43 = vpop.f32.mrf.mxu3  ;;  %v191_v0 = vadd.f32 %v190_v42, %v109_v36 }
  0x91   :  { %v223_v1 = vadd.f32 %v222_v43, %v146_v37  ;;  %v2258_v43 = vld [vmem:[%s3059_s3] sm:$0xff] }
  0x97   :  { %v115_v40 = vpop.f32.mrf.mxu0  ;;  %v193_v46 = vpop.f32.mrf.mxu2 }
  0x98   :  { %v152_v41 = vpop.f32.mrf.mxu1  ;;  %v225_v47 = vpop.f32.mrf.mxu3  ;;  %v194_v60 = vadd.f32 %v193_v46, %v112_v38  ;;  %v385_v46 = vld [vmem:[%s3060_s4 + $0x8] sm:$0x3f] }
  0x99   :  { %v226_v61 = vadd.f32 %v225_v47, %v149_v39  ;;  %v2280_v47 = vld [vmem:[%s3062_s6 + $0x78] sm:$0xff] }
  0x9f   :  { %v118_v44 = vpop.f32.mrf.mxu0  ;;  %v196_v52 = vpop.f32.mrf.mxu2 }
  0xa0   :  { %v155_v45 = vpop.f32.mrf.mxu1  ;;  %v228_v53 = vpop.f32.mrf.mxu3  ;;  %v197_v56 = vadd.f32 %v196_v52, %v115_v40  ;;  %v2307_v52 = vld [vmem:[%s3063_s7 + $0x70] sm:$0xff] }
  0xa1   :  { %v229_v57 = vadd.f32 %v228_v53, %v152_v41  ;;  %v2314_v53 = vld [vmem:[%s3062_s6 + $0x30] sm:$0xff] }
  0xa7   :  { %v275_v48 = vpop.f32.mrf.mxu0  ;;  %v199_v58 = vpop.f32.mrf.mxu2 }
  0xa8   :  { %v312_v49 = vpop.f32.mrf.mxu1  ;;  %v231_v59 = vpop.f32.mrf.mxu3  ;;  %v200_v3 = vadd.f32 %v199_v58, %v118_v44  ;;  %v324_v18 = vadd.f32 %v275_v48, %v191_v0  ;;  %v2263_v44 = vld [vmem:[%s3060_s4] sm:$0xff]  ;;  %v2285_v48 = vld [vmem:[%s3063_s7 + $0x78] sm:$0xff]  ;;  %v2341_v58 = vld [vmem:[%s3063_s7 + $0x28] sm:$0xff] }
  0xa9   :  { %v232_v4 = vadd.f32 %v231_v59, %v155_v45  ;;  %v328_v25 = vadd.f32 %v312_v49, %v223_v1  ;;  %v349_v45 = vld [vmem:[%s3059_s3 + $0x8] sm:$0x3f]  ;;  %v2290_v49 = vld [vmem:[%s3062_s6 + $0x38] sm:$0xff]  ;;  %v2348_v59 = vld [vmem:[%s3062_s6 + $0x60] sm:$0xff] }
  0xaa   :  { %533 = vmatpush.msra.mxu0 %v2290_v49 }
  0xab   :  { %v332_v34 = vmax.f32 %v324_v18, %v328_v25  ;;  %v2379_v18 = vld [vmem:[%s3062_s6 + $0x58] sm:$0xff] }
  0xac   :  { %534 = vmatpush.msra.mxu0 %v2314_v53  ;;  %v2397_v25 = vld [vmem:[%s3063_s7 + $0x18] sm:$0xff] }
  0xad   :  { %v340_v40 = vadd.f32 %v1933_v33, %v332_v34  ;;  %v2436_v34 = vld [vmem:[%s3062_s6 + $0x8] sm:$0xff] }
  0xaf   :  { %v278_v50 = vpop.f32.mrf.mxu0  ;;  %v344_v42 = vmax.f32 %v340_v40, 0.0  ;;  %v2476_v40 = vld [vmem:[%s3062_s6 + $0xb8] sm:$0xff] }
  0xb0   :  { %v315_v51 = vpop.f32.mrf.mxu1  ;;  %v325_v16 = vadd.f32 %v278_v50, %v194_v60  ;;  %v2297_v50 = vld [vmem:[%s3063_s7 + $0x38] sm:$0xff]  ;;  %v2353_v60 = vld [vmem:[%s3063_s7 + $0x60] sm:$0xff] }
  0xb1   :  { %v329_v17 = vadd.f32 %v315_v51, %v226_v61  ;;  %v2302_v51 = vld [vmem:[%s3062_s6 + $0x70] sm:$0xff]  ;;  %556 = vmatpush.msra.mxu1 %v2297_v50  ;;  %v2360_v61 = vld [vmem:[%s3062_s6 + $0x20] sm:$0xff] }
  0xb3   :  { %v333_v31 = vmax.f32 %v325_v16, %v329_v17  ;;  %v1970_v17 = vmov 0.0  }
  0xb4   :  { %52 = vst.msk [vmem:[#allocation2] sm:$0xff] %vm51_vm4, %v1970_v17 }
  0xb5   :  { %v341_v38 = vadd.f32 %v1933_v33, %v333_v31  ;;  %53 = vst.msk [vmem:[#allocation2 + $0x8] sm:$0xff] %vm51_vm4, %v1970_v17  ;;  %v2419_v31 = vld [vmem:[%s3063_s7 + $0x10] sm:$0xff] }
  0xb6   :  { %v2545_v17 = vld [vmem:[%s3063_s7 + $0x90] sm:$0xff] }
  0xb7   :  { %v281_v54 = vpop.f32.mrf.mxu0  ;;  %v345_v41 = vmax.f32 %v341_v38, 0.0  ;;  %v2460_v38 = vld [vmem:[%s3062_s6] sm:$0xff]  ;;  %3089 = vst [vmem:[#allocation14_spill] sm:$0xff] %v2545_v17 }
  0xb8   :  { %v318_v55 = vpop.f32.mrf.mxu1  ;;  %v326_v62 = vadd.f32 %v281_v54, %v197_v56  ;;  %v2319_v54 = vld [vmem:[%s3063_s7 + $0x30] sm:$0xff]  ;;  %v2331_v56 = vld [vmem:[%s3063_s7 + $0x68] sm:$0xff] }
  0xb9   :  { %v330_v63 = vadd.f32 %v318_v55, %v229_v57  ;;  %v2324_v55 = vld [vmem:[%s3062_s6 + $0x68] sm:$0xff]  ;;  %557 = vmatpush.msra.mxu1 %v2319_v54 }
  0xba   :  { %v2336_v57 = vld [vmem:[%s3062_s6 + $0x28] sm:$0xff] }
  0xbb   :  { %v334_v28 = vmax.f32 %v326_v62, %v330_v63  ;;  %v2365_v62 = vld [vmem:[%s3063_s7 + $0x20] sm:$0xff]  ;;  %535 = vmatpush.msra.mxu0 %v2336_v57  ;;  %558 = vmatpush.msra.mxu1 %v2341_v58 }
  0xbd   :  { %v342_v36 = vadd.f32 %v1933_v33, %v334_v28  ;;  %536 = vmatpush.msra.mxu0 %v2360_v61  ;;  %559 = vmatpush.msra.mxu1 %v2365_v62  ;;  %v2402_v28 = vld [vmem:[%s3062_s6 + $0x50] sm:$0xff] }
  0xbf   :  { %v284_v19 = vpop.f32.mrf.mxu0  ;;  %v346_v39 = vmax.f32 %v342_v36, 0.0  ;;  %560 = vmatpush.msra.mxu1 %v2397_v25  ;;  %v2448_v36 = vld [vmem:[%s3062_s6 + $0x40] sm:$0xff] }
  0xc0   :  { %v321_v24 = vpop.f32.mrf.mxu1  ;;  %v327_v29 = vadd.f32 %v284_v19, %v200_v3  ;;  %v2384_v19 = vld [vmem:[%s3063_s7 + $0x58] sm:$0xff] }
  0xc1   :  { %v331_v30 = vadd.f32 %v321_v24, %v232_v4  ;;  %v2389_v24 = vld [vmem:[%s3062_s6 + $0x18] sm:$0xff]  ;;  %561 = vmatpush.msra.mxu1 %v2419_v31 }
  0xc2   :  { %537 = vmatpush.msra.mxu0 %v2389_v24 }
  0xc3   :  { %v335_v32 = vmax.f32 %v327_v29, %v331_v30  ;;  %v2407_v29 = vld [vmem:[%s3063_s7 + $0x50] sm:$0xff] }
  0xc4   :  { %v2414_v30 = vld [vmem:[%s3062_s6 + $0x10] sm:$0xff] }
  0xc5   :  { %v343_v35 = vadd.f32 %v1933_v33, %v335_v32  ;;  %v2424_v32 = vld [vmem:[%s3062_s6 + $0x48] sm:$0xff]  ;;  %538 = vmatpush.msra.mxu0 %v2414_v30 }
  0xc6   :  { %v2431_v33 = vld [vmem:[%s3063_s7 + $0x48] sm:$0xff] }
  0xc7   :  { %v347_v37 = vmax.f32 %v343_v35, 0.0  ;;  %v2441_v35 = vld [vmem:[%s3063_s7 + $0x8] sm:$0xff]  ;;  %539 = vmatpush.msra.mxu0 %v2436_v34 }
  0xc8   :  { %562 = vmatpush.msra.mxu1 %v2441_v35 }
  0xc9   :  { %1741 = vmatpush.msk.msrb.mxu2 %vm357_vm2, %v347_v37  ;;  %1744 = vmatpush.msk.msrb.mxu3 %vm357_vm2, %v347_v37  ;;  %v2453_v37 = vld [vmem:[%s3063_s7 + $0x40] sm:$0xff] }
  0xca   :  { %540 = vmatpush.msra.mxu0 %v2460_v38 }
  0xcb   :  { %374 = vmatpush.msrb.mxu2 %v346_v39  ;;  %405 = vmatpush.msrb.mxu3 %v346_v39  ;;  %v2465_v39 = vld [vmem:[%s3063_s7] sm:$0xff] }
  0xcc   :  { %563 = vmatpush.msra.mxu1 %v2465_v39 }
  0xcd   :  { %375 = vmatpush.msrb.mxu2 %v345_v41  ;;  %406 = vmatpush.msrb.mxu3 %v345_v41  ;;  %v2481_v41 = vld [vmem:[%s3063_s7 + $0xb8] sm:$0xff] }
  0xce   :  { %628 = vmatpush.msrb.mxu0 %v2481_v41 }
  0xcf   :  { %376 = vmatpush.msrb.mxu2 %v344_v42  ;;  %407 = vmatpush.msrb.mxu3 %v344_v42  ;;  %v2486_v42 = vld [vmem:[%s3062_s6 + $0xb0] sm:$0xff] }
  0xd0   :  { %1742 = vmatmul.msk.f32.vlgmr.msrb.gmra.mxu2 %vm350_vm3, %v2258_v43  ;;  %1745 = vmatmul.msk.f32.vlgmr.msrb.gmra.mxu3 %vm350_vm3, %v2263_v44 }
  0xd1   :  { %472 = vmatpush.msra.mxu2 %v2280_v47  ;;  %504 = vmatpush.msra.mxu3 %v2285_v48 }
  0xd3   :  { %473 = vmatpush.msra.mxu2 %v2302_v51  ;;  %505 = vmatpush.msra.mxu3 %v2307_v52 }
  0xd5   :  { %474 = vmatpush.msra.mxu2 %v2324_v55  ;;  %506 = vmatpush.msra.mxu3 %v2331_v56 }
  0xd7   :  { %475 = vmatpush.msra.mxu2 %v2348_v59  ;;  %507 = vmatpush.msra.mxu3 %v2353_v60 }
  0xd8   :  { %1743 = vmatmul.msk.f32.gmra.mxu2 %vm350_vm3, %v349_v45  ;;  %1746 = vmatmul.msk.f32.gmra.mxu3 %vm350_vm3, %v385_v46  ;;  %v2493_v45 = vld [vmem:[%s3063_s7 + $0xb0] sm:$0xff]  ;;  %v2499_v46 = vld [vmem:[%s3062_s6 + $0xa8] sm:$0xff] }
  0xd9   :  { %476 = vmatpush.msra.mxu2 %v2379_v18  ;;  %508 = vmatpush.msra.mxu3 %v2384_v19  ;;  %3082 = vst [vmem:[#allocation7_spill] sm:$0xff] %v2499_v46 }
  0xda   :  { %629 = vmatpush.msrb.mxu0 %v2493_v45 }
  0xdb   :  { %477 = vmatpush.msra.mxu2 %v2402_v28  ;;  %509 = vmatpush.msra.mxu3 %v2407_v29 }
  0xdd   :  { %478 = vmatpush.msra.mxu2 %v2424_v32  ;;  %510 = vmatpush.msra.mxu3 %v2431_v33 }
  0xdf   :  { %479 = vmatpush.msra.mxu2 %v2448_v36  ;;  %511 = vmatpush.msra.mxu3 %v2453_v37 }
  0xe1   :  { %596 = vmatpush.msrb.mxu2 %v2476_v40  ;;  %1916 = vmatpush.msrb.mxu3 %v2481_v41 }
  0xe3   :  { %597 = vmatpush.msrb.mxu2 %v2486_v42  ;;  %1917 = vmatpush.msrb.mxu3 %v2493_v45 }
  0xe5   :  { %598 = vmatpush.msrb.mxu2 %v2499_v46 }
 0x153   :  { %v378_v63 = vpop.f32.mrf.mxu2  ;;  %v409_v0 = vpop.f32.mrf.mxu3 }
 0x154   :  { %v415_v1 = vmax.f32 %v378_v63, %v409_v0  ;;  %v2504_v63 = vld [vmem:[%s3063_s7 + $0xa8] sm:$0xff]  ;;  %v2512_v0 = vld [vmem:[%s3062_s6 + $0xa0] sm:$0xff] }
 0x155   :  { %3083 = vst [vmem:[#allocation8_spill] sm:$0xff] %v2504_v63  ;;  %630 = vmatpush.msrb.mxu0 %v2504_v63  ;;  %1918 = vmatpush.msrb.mxu3 %v2504_v63 }
 0x156   :  { %419 = vrot.lane.b32.xlu0 %v415_v1, %s1969_s27  ;;  %3084 = vst [vmem:[#allocation9_spill] sm:$0xff] %v2512_v0  ;;  %v2517_v1 = vld [vmem:[%s3063_s7 + $0xa0] sm:$0xff]  ;;  %599 = vmatpush.msrb.mxu2 %v2512_v0  ;;  %v2556_v0 = vld [vmem:[%s3063_s7 + $0x88] sm:$0xff] }
 0x157   :  { %3085 = vst [vmem:[#allocation10_spill] sm:$0xff] %v2517_v1  ;;  %631 = vmatpush.msrb.mxu0 %v2517_v1  ;;  %1919 = vmatpush.msrb.mxu3 %v2517_v1  ;;  %v2551_v1 = vld [vmem:[%s3062_s6 + $0x88] sm:$0xff] }
 0x15b   :  { %v381_v3 = vpop.f32.mrf.mxu2  ;;  %v412_v4 = vpop.f32.mrf.mxu3 }
 0x15c   :  { %v416_v16 = vmax.f32 %v381_v3, %v412_v4  ;;  %v2528_v3 = vld [vmem:[%s3062_s6 + $0x98] sm:$0xff] }
 0x15d   :  { %3086 = vst [vmem:[#allocation11_spill] sm:$0xff] %v2528_v3  ;;  %v2533_v4 = vld [vmem:[%s3063_s7 + $0x98] sm:$0xff]  ;;  %600 = vmatpush.msrb.mxu2 %v2528_v3  ;;  %v2569_v3 = vld [vmem:[%s3063_s7 + $0x80] sm:$0xff] }
 0x15e   :  { %421 = vrot.lane.b32.xlu0 %v416_v16, %s1969_s27  ;;  %3087 = vst [vmem:[#allocation12_spill] sm:$0xff] %v2533_v4  ;;  %v2538_v16 = vld [vmem:[%s3062_s6 + $0x90] sm:$0xff]  ;;  %632 = vmatpush.msrb.mxu0 %v2533_v4 }
 0x15f   :  { %3088 = vst [vmem:[#allocation13_spill] sm:$0xff] %v2538_v16  ;;  %1920 = vmatpush.msrb.mxu3 %v2533_v4  ;;  %601 = vmatpush.msrb.mxu2 %v2538_v16  ;;  %v2564_v4 = vld [vmem:[%s3062_s6 + $0x80] sm:$0xff] }
 0x160   :  { %633 = vmatpush.msrb.mxu0 %v2545_v17  ;;  %3090 = vst [vmem:[#allocation15_spill] sm:$0xff] %v2564_v4 }
 0x161   :  { %1921 = vmatpush.msrb.mxu3 %v2545_v17  ;;  %3091 = vst [vmem:[#allocation16_spill] sm:$0xff] %v2569_v3  ;;  %602 = vmatpush.msrb.mxu2 %v2551_v1 }
 0x162   :  { %634 = vmatpush.msrb.mxu0 %v2556_v0 }
 0x163   :  { %1922 = vmatpush.msrb.mxu3 %v2556_v0  ;;  %603 = vmatpush.msrb.mxu2 %v2564_v4 }
 0x164   :  { %635 = vmatpush.msrb.mxu0 %v2569_v3 }
 0x165   :  { %1923 = vmatpush.msrb.mxu3 %v2569_v3 }
 0x1c8   :  { %v420_v17 = vpop.permute.xlu0 %419 }
 0x1c9   :  { %426 = vst.msk [vmem:[#allocation2 + $0x1] sm:$0xff] %vm425_vm5, %v420_v17 }
 0x1d0   :  { %v422_v16 = vpop.permute.xlu0 %421  ;;  %v447_v63 = vld [vmem:[#allocation2 + $0x1] sm:$0xff] }
 0x1d1   :  { %v429_v46 = vld [vmem:[#allocation2] sm:$0xff]  ;;  %428 = vst.msk [vmem:[#allocation2 + $0x9] sm:$0x3f] %vm427_vm6, %v422_v16  ;;  %1755 = vmatmul.msk.f32.vlgmr.msra.gmra.mxu2 %vm51_vm4, %v447_v63  ;;  %1765 = vmatmul.msk.f32.vlgmr.msra.gmra.mxu3 %vm51_vm4, %v447_v63  ;;  %v1818_v63 = vld [vmem:[%s3058_s2 + $0x38] sm:$0x3f] }
 0x1d2   :  { %1767 = vmatmul.msk.f32.vlgmr.msra.gmra.mxu0 %vm51_vm4, %v429_v46  ;;  %1769 = vmatmul.msk.f32.vlgmr.msra.gmra.mxu1 %vm51_vm4, %v429_v46  ;;  %v1809_v46 = vld [vmem:[%s3057_s1 + $0x38] sm:$0x3f] }
 0x1d3   :  { %1810 = vmatpush.msk.msra.mxu2 %vm88_vm0, %v1809_v46  ;;  %1819 = vmatpush.msk.msra.mxu3 %vm88_vm0, %v1818_v63 }
 0x1d5   :  { %828 = vmatpush.msra.mxu2 %v2067_v2  ;;  %864 = vmatpush.msra.mxu3 %v2080_v5  ;;  %v1803_v2 = vld [vmem:[%s3056_s0 + $0x29] sm:$0xff]  ;;  %v1804_v5 = vld [vmem:[%s3056_s0 + $0x31] sm:$0xff] }
 0x1d7   :  { %829 = vmatpush.msra.mxu2 %v2097_v8  ;;  %865 = vmatpush.msra.mxu3 %v2104_v9  ;;  %v1805_v8 = vld [vmem:[%s3056_s0 + $0x39] sm:$0xf] }
 0x1d8   :  { %v448_v4 = vld [vmem:[#allocation2 + $0x9] sm:$0x3f] }
 0x1d9   :  { %v430_v3 = vld [vmem:[#allocation2 + $0x8] sm:$0x3f]  ;;  %1756 = vmatmul.msk.f32.gmra.mxu2 %vm51_vm4, %v448_v4  ;;  %1766 = vmatmul.msk.f32.gmra.mxu3 %vm51_vm4, %v448_v4  ;;  %v1850_v4 = vld [vmem:[%s3058_s2 + $0x58] sm:$0x3f] }
 0x1da   :  { %1768 = vmatmul.msk.f32.gmra.mxu0 %vm51_vm4, %v430_v3  ;;  %1770 = vmatmul.msk.f32.gmra.mxu1 %vm51_vm4, %v430_v3  ;;  %v571_v17 = vld [vmem:[#allocation2 + $0x2] sm:$0xff]  ;;  %v572_v16 = vld [vmem:[#allocation2 + $0xa] sm:$0x3f]  ;;  %v1802_v3 = vld [vmem:[%s3056_s0 + $0x21] sm:$0xff] }
 0x1db   :  { %830 = vmatpush.msra.mxu2 %v2121_v12  ;;  %866 = vmatpush.msra.mxu3 %v2126_v13  ;;  %v1841_v13 = vld [vmem:[%s3057_s1 + $0x58] sm:$0x3f] }
 0x1e1   :  { %1779 = vmatmul.msk.f32.vlgmr.msrb.gmra.mxu2 %vm51_vm4, %v571_v17  ;;  %1790 = vmatmul.msk.f32.vlgmr.msrb.gmra.mxu3 %vm51_vm4, %v572_v16 }
 0x1e2   :  { %1789 = vmatmul.msk.f32.vlgmr.msrb.gmra.mxu0 %vm51_vm4, %v571_v17  ;;  %1842 = vmatpush.msk.msrb.mxu2 %vm88_vm0, %v1841_v13  ;;  %v791_v13 = vld [vmem:[%s3058_s2 + $0x18] sm:$0x3f] }
 0x1e3   :  { %1851 = vmatpush.msk.msrb.mxu3 %vm88_vm0, %v1850_v4  ;;  %v1798_v4 = vld [vmem:[%s3056_s0 + $0x20] sm:$0xff] }
 0x1e4   :  { %992 = vmatpush.msrb.mxu2 %v2165_v20 }
 0x1e5   :  { %1028 = vmatpush.msrb.mxu3 %v2170_v21 }
 0x1e6   :  { %993 = vmatpush.msrb.mxu2 %v2175_v22 }
 0x1e7   :  { %1029 = vmatpush.msrb.mxu3 %v2182_v23  ;;  %v1835_v23 = vld [vmem:[%s3056_s0 + $0x2a] sm:$0xff] }
 0x1e8   :  { %994 = vmatpush.msrb.mxu2 %v2197_v26 }
 0x1e9   :  { %1780 = vmatmul.msk.f32.gmra.mxu2 %vm51_vm4, %v572_v16  ;;  %1820 = vmatmul.msk.f32.vlgmr.msra.gmra.mxu3 %vm75_vm1, %v1802_v3  ;;  %v1834_v16 = vld [vmem:[%s3056_s0 + $0x22] sm:$0xff] }
 0x1ea   :  { %1030 = vmatpush.msrb.mxu3 %v2202_v27 }
 0x1ec   :  { %1270 = vmatpush.msra.mxu3 %v2297_v50 }
 0x1ee   :  { %1271 = vmatpush.msra.mxu3 %v2319_v54 }
 0x1f0   :  { %1272 = vmatpush.msra.mxu3 %v2341_v58  ;;  %v1836_v58 = vld [vmem:[%s3056_s0 + $0x32] sm:$0xff] }
 0x1f1   :  { %1811 = vmatmul.msk.f32.vlgmr.msra.gmra.mxu2 %vm75_vm1, %v1802_v3  ;;  %1821 = vmatmul.msk.f32.gmra.mxu3 %vm75_vm1, %v1803_v2  ;;  %v1934_v3 = vld [vmem:[%s3066_s10] ss:$0 sm:$0xff] }
 0x1f2   :  { %1247 = vmatpush.msra.mxu2 %v2290_v49  ;;  %1273 = vmatpush.msra.mxu3 %v2365_v62 }
 0x1f4   :  { %1248 = vmatpush.msra.mxu2 %v2314_v53  ;;  %1274 = vmatpush.msra.mxu3 %v2397_v25 }
 0x1f6   :  { %1249 = vmatpush.msra.mxu2 %v2336_v57  ;;  %1275 = vmatpush.msra.mxu3 %v2419_v31 }
 0x1f8   :  { %1250 = vmatpush.msra.mxu2 %v2360_v61  ;;  %1276 = vmatpush.msra.mxu3 %v2441_v35 }
 0x1f9   :  { %1812 = vmatmul.msk.f32.gmra.mxu2 %vm75_vm1, %v1803_v2  ;;  %1822 = vmatmul.msk.f32.gmra.mxu3 %vm75_vm1, %v1804_v5 }
 0x1fa   :  { %1251 = vmatpush.msra.mxu2 %v2389_v24  ;;  %1277 = vmatpush.msra.mxu3 %v2465_v39 }
 0x1fc   :  { %1252 = vmatpush.msra.mxu2 %v2414_v30 }
 0x1fe   :  { %1253 = vmatpush.msra.mxu2 %v2436_v34 }
 0x200   :  { %1254 = vmatpush.msra.mxu2 %v2460_v38  ;;  %v1837_v38 = vld [vmem:[%s3056_s0 + $0x3a] sm:$0xf] }
 0x201   :  { %1813 = vmatmul.msk.f32.gmra.mxu2 %vm75_vm1, %v1804_v5  ;;  %1823 = vmatmul.msk.f32.gmra.mxu3 %vm75_vm1, %v1805_v8 }
 0x209   :  { %1814 = vmatmul.msk.f32.gmra.mxu2 %vm75_vm1, %v1805_v8  ;;  %1852 = vmatmul.msk.f32.vlgmr.msrb.gmra.mxu3 %vm75_vm1, %v1834_v16  ;;  %v657_v8 = vld [vmem:[%s3064_s8] sm:$0x7f] }
 0x211   :  { %1843 = vmatmul.msk.f32.vlgmr.msrb.gmra.mxu2 %vm75_vm1, %v1834_v16  ;;  %1853 = vmatmul.msk.f32.gmra.mxu3 %vm75_vm1, %v1835_v23 }
 0x219   :  { %1844 = vmatmul.msk.f32.gmra.mxu2 %vm75_vm1, %v1835_v23  ;;  %1854 = vmatmul.msk.f32.gmra.mxu3 %vm75_vm1, %v1836_v58 }
 0x221   :  { %1845 = vmatmul.msk.f32.gmra.mxu2 %vm75_vm1, %v1836_v58  ;;  %1855 = vmatmul.msk.f32.gmra.mxu3 %vm75_vm1, %v1837_v38 }
 0x229   :  { %1846 = vmatmul.msk.f32.gmra.mxu2 %vm75_vm1, %v1837_v38 }
 0x24f   :  { %v542_v9 = vpop.f32.mrf.mxu0  ;;  %v565_v21 = vpop.f32.mrf.mxu1 }
 0x254   :  { %v481_v12 = vpop.f32.mrf.mxu2  ;;  %v513_v17 = vpop.f32.mrf.mxu3 }
 0x255   :  { %v543_v27 = vadd.f32 %v542_v9, %v481_v12  ;;  %v566_v50 = vadd.f32 %v565_v21, %v513_v17  ;;  %v685_v9 = vld [vmem:[%s3065_s9] sm:$0x7f]  ;;  %v787_v12 = vld [vmem:[%s3057_s1 + $0x18] sm:$0x3f] }
 0x257   :  { %v545_v20 = vpop.f32.mrf.mxu0  ;;  %v568_v54 = vpop.f32.mrf.mxu1 }
 0x25c   :  { %v484_v46 = vpop.f32.mrf.mxu2  ;;  %v516_v22 = vpop.f32.mrf.mxu3 }
 0x25d   :  { %v546_v61 = vadd.f32 %v545_v20, %v484_v46  ;;  %v569_v62 = vadd.f32 %v568_v54, %v516_v22 }
 0x25f   :  { %v637_v49 = vpop.f32.mrf.mxu0 }
 0x260   :  { %v645_v24 = vadd.f32 %v637_v49, %v566_v50 }
 0x264   :  { %v605_v26 = vpop.f32.mrf.mxu2  ;;  %v640_v57 = vpop.f32.mrf.mxu3 }
 0x265   :  { %v643_v53 = vadd.f32 %v605_v26, %v543_v27  ;;  %v646_v31 = vadd.f32 %v640_v57, %v569_v62 }
 0x267   :  { %v647_v30 = vmax.f32 %v643_v53, %v645_v24 }
 0x269   :  { %v653_v2 = vadd.f32 %v1934_v3, %v647_v30 }
 0x26b   :  { %v655_v39 = vmax.f32 %v653_v2, 0.0 }
 0x26c   :  { %v608_v25 = vpop.f32.mrf.mxu2 }
 0x26d   :  { %v644_v63 = vadd.f32 %v608_v25, %v546_v61 }
 0x26f   :  { %v648_v34 = vmax.f32 %v644_v63, %v646_v31 }
 0x271   :  { %v654_v35 = vadd.f32 %v1934_v3, %v648_v34 }
 0x273   :  { %v656_v5 = vmax.f32 %v654_v35, 0.0 }
 0x275   :  { %1791 = vmatpush.msk.msra.mxu0 %vm88_vm0, %v656_v5  ;;  %1793 = vmatpush.msk.msrb.mxu1 %vm88_vm0, %v656_v5 }
 0x277   :  { %680 = vmatpush.msra.mxu0 %v655_v39  ;;  %704 = vmatpush.msrb.mxu1 %v655_v39 }
 0x278   :  { %1792 = vmatmul.msk.f32.vlgmr.msra.gmra.mxu0 %vm658_vm7, %v657_v8  ;;  %1794 = vmatmul.msk.f32.vlgmr.msrb.gmra.mxu1 %vm658_vm7, %v685_v9 }
 0x279   :  { %1824 = vmatpush.msk.msrb.mxu0 %vm88_vm0, %v787_v12  ;;  %1829 = vmatpush.msk.msra.mxu1 %vm88_vm0, %v791_v13 }
 0x27b   :  { %908 = vmatpush.msrb.mxu0 %v2087_v6  ;;  %940 = vmatpush.msra.mxu1 %v2092_v7  ;;  %v1799_v6 = vld [vmem:[%s3056_s0 + $0x28] sm:$0xff]  ;;  %v1800_v7 = vld [vmem:[%s3056_s0 + $0x30] sm:$0xff] }
 0x27d   :  { %909 = vmatpush.msrb.mxu0 %v2109_v10  ;;  %941 = vmatpush.msra.mxu1 %v2114_v11  ;;  %v1801_v10 = vld [vmem:[%s3056_s0 + $0x38] sm:$0xf]  ;;  %v832_v11 = vpop.f32.mrf.mxu2  ;;  %s1971_s0 = smov 56  }
 0x27f   :  { %910 = vmatpush.msrb.mxu0 %v2133_v14  ;;  %942 = vmatpush.msra.mxu1 %v2138_v15  ;;  %v868_v14 = vpop.f32.mrf.mxu3 }
 0x280   :  { %1825 = vmatmul.msk.f32.vlgmr.msrb.gmra.mxu0 %vm75_vm1, %v1798_v4  ;;  %1830 = vmatmul.msk.f32.vlgmr.msra.gmra.mxu1 %vm75_vm1, %v1798_v4 }
 0x285   :  { %v835_v15 = vpop.f32.mrf.mxu2 }
 0x287   :  { %v871_v17 = vpop.f32.mrf.mxu3 }
 0x288   :  { %1826 = vmatmul.msk.f32.gmra.mxu0 %vm75_vm1, %v1799_v6  ;;  %1831 = vmatmul.msk.f32.gmra.mxu1 %vm75_vm1, %v1799_v6 }
 0x28d   :  { %v838_v16 = vpop.f32.mrf.mxu2 }
 0x28f   :  { %v874_v46 = vpop.f32.mrf.mxu3 }
 0x290   :  { %1827 = vmatmul.msk.f32.gmra.mxu0 %vm75_vm1, %v1800_v7  ;;  %1832 = vmatmul.msk.f32.gmra.mxu1 %vm75_vm1, %v1800_v7 }
 0x295   :  { %v841_v20 = vpop.f32.mrf.mxu2 }
 0x297   :  { %v877_v21 = vpop.f32.mrf.mxu3 }
 0x298   :  { %1828 = vmatmul.msk.f32.gmra.mxu0 %vm75_vm1, %v1801_v10  ;;  %1833 = vmatmul.msk.f32.gmra.mxu1 %vm75_vm1, %v1801_v10  ;;  %vm749_vm1 = vcmask 785408  }
 0x29d   :  { %v996_v27 = vpop.f32.mrf.mxu2 }
 0x29f   :  { %v1032_v49 = vpop.f32.mrf.mxu3 }
 0x2a5   :  { %v999_v58 = vpop.f32.mrf.mxu2 }
 0x2a7   :  { %v1035_v61 = vpop.f32.mrf.mxu3 }
 0x2ad   :  { %v1002_v30 = vpop.f32.mrf.mxu2 }
 0x2af   :  { %v1038_v31 = vpop.f32.mrf.mxu3 }
 0x2b5   :  { %v1005_v13 = vpop.f32.mrf.mxu2 }
 0x2b7   :  { %v1041_v4 = vpop.f32.mrf.mxu3 }
 0x2f5   :  { %v682_v22 = vpop.f32.mrf.mxu0  ;;  %v706_v23 = vpop.f32.mrf.mxu1 }
 0x2f6   :  { %v709_v26 = vmax.f32 %v682_v22, %v706_v23 }
 0x2f8   :  { %720 = vst.sshfl [vmem:[#allocation1] sm:$0xff pattern:$0x73625140] %v709_v26  ;;  %v1795_v50 = vrot.slane %v709_v26, 9 }
 0x2f9   :  { %711 = vst.msk [vmem:[#allocation3] sm:$0x1] %vm710_vm8, %v709_v26 }
 0x2fa   :  { %715 = vrot.lane.b32.xlu0 %v1795_v50, %s1971_s0 }
 0x2fd   :  { %v912_v53 = vpop.f32.mrf.mxu0  ;;  %v944_v54 = vpop.f32.mrf.mxu1 }
 0x2fe   :  { %v913_v39 = vadd.f32 %v912_v53, %v832_v11  ;;  %v945_v8 = vadd.f32 %v944_v54, %v868_v14 }
 0x2ff   :  { %v722_v57 = vld [vmem:[#allocation1 + $0x1] ss:$4 sm:$0xff] }
 0x300   :  { %723 = vrot.lane.b32.xlu2 %v722_v57, %s1972_s28  ;;  %733 = vst.sshfl [vmem:[#allocation1] sm:$0xff pattern:$0x73625140] %v709_v26  ;;  %v1044_v57 = vadd.f32 %v996_v27, %v913_v39  ;;  %v1629_v39 = vld [vmem:[%s3069_s13 + $0x40] sm:$0xff] }
 0x305   :  { %v915_v62 = vpop.f32.mrf.mxu0  ;;  %v947_v24 = vpop.f32.mrf.mxu1 }
 0x306   :  { %v916_v5 = vadd.f32 %v915_v62, %v835_v15  ;;  %v948_v38 = vadd.f32 %v947_v24, %v871_v17  ;;  %v1935_v17 = vld [vmem:[%s3061_s5] ss:$0 sm:$0xff]  ;;  %v1069_v24 = vld [vmem:[%s3059_s3 + $0x8] sm:$0x3f]  ;;  %s1974_s3 = smov 96  }
 0x307   :  { %v2725_v25 = vld [vmem:[#allocation1 + $0x1] ss:$4 sm:$0xff] }
 0x308   :  { %3092 = vst [vmem:[#allocation17_spill] sm:$0xff] %v2725_v25  ;;  %v1045_v10 = vadd.f32 %v999_v58, %v916_v5  ;;  %v1049_v22 = vadd.f32 %v1035_v61, %v948_v38 }
 0x309   :  { %743 = vst.sshfl [vmem:[#allocation1] sm:$0xff pattern:$0x73625140] %v709_v26 }
 0x30a   :  { %v1053_v11 = vmax.f32 %v1045_v10, %v1049_v22 }
 0x30d   :  { %v918_v63 = vpop.f32.mrf.mxu0  ;;  %v950_v3 = vpop.f32.mrf.mxu1 }
 0x30e   :  { %v919_v35 = vadd.f32 %v918_v63, %v838_v16  ;;  %v951_v2 = vadd.f32 %v950_v3, %v874_v46  ;;  %v1048_v16 = vadd.f32 %v1032_v49, %v945_v8 }
 0x310   :  { %v2727_v34 = vld [vmem:[#allocation1 + $0x2] ss:$4 sm:$0xff]  ;;  %v1046_v9 = vadd.f32 %v1002_v30, %v919_v35  ;;  %v1050_v12 = vadd.f32 %v1038_v31, %v951_v2  ;;  %v1052_v53 = vmax.f32 %v1044_v57, %v1048_v16 }
 0x311   :  { %756 = vst.sshfl [vmem:[#allocation1] sm:$0xff pattern:$0x73625140] %v709_v26  ;;  %v1103_v30 = vld [vmem:[%s3060_s4 + $0x8] sm:$0x3f]  ;;  %s1975_s4 = smov 40  }
 0x312   :  { %v1054_v46 = vmax.f32 %v1046_v9, %v1050_v12  ;;  %v1060_v49 = vadd.f32 %v1935_v17, %v1052_v53 }
 0x314   :  { %v1062_v58 = vadd.f32 %v1935_v17, %v1054_v46  ;;  %v1064_v62 = vmax.f32 %v1060_v49, 0.0 }
 0x315   :  { %v921_v6 = vpop.f32.mrf.mxu0  ;;  %v953_v7 = vpop.f32.mrf.mxu1 }
 0x316   :  { %v922_v23 = vadd.f32 %v921_v6, %v841_v20  ;;  %v954_v50 = vadd.f32 %v953_v7, %v877_v21  ;;  %v1061_v20 = vadd.f32 %v1935_v17, %v1053_v11  ;;  %v1066_v27 = vmax.f32 %v1062_v58, 0.0 }
 0x318   :  { %v2729_v25 = vld [vmem:[#allocation1 + $0x2] ss:$4 sm:$0xff]  ;;  %v1047_v63 = vadd.f32 %v1005_v13, %v922_v23  ;;  %v1051_v15 = vadd.f32 %v1041_v4, %v954_v50 }
 0x319   :  { %766 = vst.sshfl [vmem:[#allocation1] sm:$0xff pattern:$0x73625140] %v709_v26  ;;  %v1065_v26 = vmax.f32 %v1061_v20, 0.0 }
 0x31a   :  { %v1055_v14 = vmax.f32 %v1047_v63, %v1051_v15 }
 0x31c   :  { %v1063_v54 = vadd.f32 %v1935_v17, %v1055_v14 }
 0x31e   :  { %v1067_v61 = vmax.f32 %v1063_v54, 0.0 }
 0x320   :  { %v768_v21 = vld [vmem:[#allocation1 + $0x3] ss:$4 sm:$0xff]  ;;  %1856 = vmatpush.msk.msra.mxu0 %vm357_vm2, %v1067_v61  ;;  %1859 = vmatpush.msk.msrb.mxu1 %vm357_vm2, %v1067_v61 }
 0x321   :  { %769 = vrot.lane.b32.xlu2 %v768_v21, %s1973_s16 }
 0x322   :  { %1092 = vmatpush.msra.mxu0 %v1066_v27  ;;  %1123 = vmatpush.msrb.mxu1 %v1066_v27  ;;  %v1936_v27 = vld [vmem:[%s3066_s10] ss:$0 sm:$0xff] }
 0x324   :  { %1093 = vmatpush.msra.mxu0 %v1065_v26  ;;  %1124 = vmatpush.msrb.mxu1 %v1065_v26 }
 0x326   :  { %1094 = vmatpush.msra.mxu0 %v1064_v62  ;;  %1125 = vmatpush.msrb.mxu1 %v1064_v62 }
 0x327   :  { %1857 = vmatmul.msk.f32.vlgmr.msra.gmra.mxu0 %vm350_vm3, %v2258_v43  ;;  %1860 = vmatmul.msk.f32.vlgmr.msrb.gmra.mxu1 %vm350_vm3, %v2263_v44  ;;  %v3093_v43 = vld [vmem:[#allocation7_spill] sm:$0xff]  ;;  %v3094_v44 = vld [vmem:[#allocation8_spill] sm:$0xff] }
 0x328   :  { %1187 = vmatpush.msrb.mxu0 %v2280_v47  ;;  %1218 = vmatpush.msra.mxu1 %v2285_v48  ;;  %v3095_v47 = vld [vmem:[#allocation9_spill] sm:$0xff]  ;;  %v3096_v48 = vld [vmem:[#allocation10_spill] sm:$0xff] }
 0x32a   :  { %1188 = vmatpush.msrb.mxu0 %v2302_v51  ;;  %1219 = vmatpush.msra.mxu1 %v2307_v52  ;;  %v3097_v51 = vld [vmem:[#allocation11_spill] sm:$0xff]  ;;  %v3098_v52 = vld [vmem:[#allocation12_spill] sm:$0xff] }
 0x32c   :  { %1189 = vmatpush.msrb.mxu0 %v2324_v55  ;;  %1220 = vmatpush.msra.mxu1 %v2331_v56  ;;  %v3099_v55 = vld [vmem:[#allocation13_spill] sm:$0xff]  ;;  %v3100_v56 = vld [vmem:[#allocation14_spill] sm:$0xff] }
 0x32e   :  { %1190 = vmatpush.msrb.mxu0 %v2348_v59  ;;  %1221 = vmatpush.msra.mxu1 %v2353_v60  ;;  %v3101_v59 = vld [vmem:[#allocation15_spill] sm:$0xff]  ;;  %v3102_v60 = vld [vmem:[#allocation16_spill] sm:$0xff] }
 0x32f   :  { %1858 = vmatmul.msk.f32.gmra.mxu0 %vm350_vm3, %v1069_v24  ;;  %1861 = vmatmul.msk.f32.gmra.mxu1 %vm350_vm3, %v1103_v30  ;;  %vm741_vm3 = vcmask 778560  }
 0x330   :  { %1191 = vmatpush.msrb.mxu0 %v2379_v18  ;;  %1222 = vmatpush.msra.mxu1 %v2384_v19 }
 0x332   :  { %1192 = vmatpush.msrb.mxu0 %v2402_v28  ;;  %1223 = vmatpush.msra.mxu1 %v2407_v29  ;;  %v1490_v28 = vld [vmem:[%s3067_s11 + $0x78] sm:$0xff] }
 0x334   :  { %1193 = vmatpush.msrb.mxu0 %v2424_v32  ;;  %1224 = vmatpush.msra.mxu1 %v2431_v33 }
 0x336   :  { %1194 = vmatpush.msrb.mxu0 %v2448_v36  ;;  %1225 = vmatpush.msra.mxu1 %v2453_v37 }
 0x338   :  { %1309 = vmatpush.msra.mxu0 %v2476_v40  ;;  %1340 = vmatpush.msrb.mxu1 %v2481_v41 }
 0x33a   :  { %1310 = vmatpush.msra.mxu0 %v2486_v42  ;;  %1341 = vmatpush.msrb.mxu1 %v2493_v45  ;;  %v3105_v45 = vld [vmem:[#allocation17_spill] sm:$0xff] }
 0x33c   :  { %1311 = vmatpush.msra.mxu0 %v3093_v43  ;;  %1342 = vmatpush.msrb.mxu1 %v3094_v44  ;;  %v1369_v43 = vld [vmem:[%s3064_s8] sm:$0x7f]  ;;  %s1976_s8 = smov 24  }
 0x33d   :  { %v1396_v44 = vld [vmem:[%s3065_s9] sm:$0x7f] }
 0x33e   :  { %1312 = vmatpush.msra.mxu0 %v3095_v47  ;;  %1343 = vmatpush.msrb.mxu1 %v3096_v48 }
 0x340   :  { %1313 = vmatpush.msra.mxu0 %v3097_v51  ;;  %1344 = vmatpush.msrb.mxu1 %v3098_v52 }
 0x342   :  { %1314 = vmatpush.msra.mxu0 %v3099_v55  ;;  %1345 = vmatpush.msrb.mxu1 %v3100_v56 }
 0x344   :  { %1315 = vmatpush.msra.mxu0 %v2551_v1  ;;  %1346 = vmatpush.msrb.mxu1 %v2556_v0  ;;  %v1796_v0 = vrot.slane %v3105_v45, 9 }
 0x346   :  { %1316 = vmatpush.msra.mxu0 %v3101_v59  ;;  %1347 = vmatpush.msrb.mxu1 %v3102_v60  ;;  %v1797_v59 = vrot.slane %v2729_v25, 9 }
 0x35a   :  { %v724_v18 = vpop.permute.xlu2 %723 }
 0x35b   :  { %v725_v19 = vrot.slane %v724_v18, 6 }
 0x35d   :  { %v727_v32 = vsel %vm726_vm11, %v725_v19, %v724_v18 }
 0x36c   :  { %v716_v29 = vpop.permute.xlu0 %715 }
 0x36d   :  { %719 = vst.msk [vmem:[#allocation3] sm:$0x1] %vm718_vm12, %v716_v29 }
 0x36e   :  { %732 = vst.msk [vmem:[#allocation3] sm:$0x5] %vm2781_vm13, %v727_v32 }
 0x3a4   :  { %v1096_v33 = vpop.f32.mrf.mxu0  ;;  %v1127_v36 = vpop.f32.mrf.mxu1 }
 0x3a5   :  { %v1133_v37 = vmax.f32 %v1096_v33, %v1127_v36  ;;  %v770_v33 = vpop.permute.xlu2 %769 }
 0x3a7   :  { %1137 = vrot.lane.b32.xlu1 %v1133_v37, %s1969_s27 }
 0x3ac   :  { %v1099_v40 = vpop.f32.mrf.mxu0  ;;  %v1130_v41 = vpop.f32.mrf.mxu1 }
 0x3ad   :  { %v1134_v42 = vmax.f32 %v1099_v40, %v1130_v41  ;;  %v771_v41 = vrot.slane %v770_v33, 6 }
 0x3af   :  { %1139 = vrot.lane.b32.xlu1 %v1134_v42, %s1969_s27  ;;  %v1626_v42 = vld [vmem:[%s3069_s13 + $0x28] sm:$0xff] }
 0x3b7   :  { %746 = vrot.lane.b32.xlu1 %v2727_v34, %s1974_s3 }
 0x3bf   :  { %738 = vrot.lane.b32.xlu1 %v1796_v0, %s1975_s4 }
 0x419   :  { %v1138_v1 = vpop.permute.xlu1 %1137 }
 0x41a   :  { %1143 = vst.msk [vmem:[#allocation2 + $0x1] sm:$0xff] %vm425_vm5, %v1138_v1  ;;  %vm2805_vm5 = vmor %vm753_vm15, %vm752_vm14  ;;  %v1506_v1 = vld [vmem:[%s3067_s11 + $0xf8] sm:$0xff] }
 0x421   :  { %v1140_v31 = vpop.permute.xlu1 %1139  ;;  %v1163_v3 = vld [vmem:[#allocation2 + $0x1] sm:$0xff] }
 0x422   :  { %v1145_v35 = vld [vmem:[#allocation2] sm:$0xff]  ;;  %1144 = vst.msk [vmem:[#allocation2 + $0x9] sm:$0x3f] %vm427_vm6, %v1140_v31  ;;  %1870 = vmatmul.msk.f32.vlgmr.msrb.gmra.mxu0 %vm51_vm4, %v1163_v3  ;;  %1880 = vmatmul.msk.f32.vlgmr.msra.gmra.mxu1 %vm51_vm4, %v1163_v3  ;;  %vm772_vm6 = vcmask 654336   ;;  %v1522_v31 = vld [vmem:[%s3067_s11 + $0x178] sm:$0xff]  ;;  %v1489_v3 = vld [vmem:[%s3067_s11 + $0x70] sm:$0xff] }
 0x423   :  { %1882 = vmatmul.msk.f32.vlgmr.msra.gmra.mxu2 %vm51_vm4, %v1145_v35  ;;  %1884 = vmatmul.msk.f32.vlgmr.msra.gmra.mxu3 %vm51_vm4, %v1145_v35  ;;  %v773_v0 = vsel %vm772_vm6, %v771_v41, %v770_v33  ;;  %v1505_v35 = vld [vmem:[%s3067_s11 + $0xf0] sm:$0xff]  ;;  %v1632_v33 = vld [vmem:[%s3069_s13 + $0x58] sm:$0xff] }
 0x424   :  { %1540 = vmatpush.msrb.mxu0 %v1490_v28  ;;  %1560 = vmatpush.msra.mxu1 %v1506_v1 }
 0x426   :  { %1541 = vmatpush.msrb.mxu0 %v1489_v3  ;;  %1561 = vmatpush.msra.mxu1 %v1505_v35 }
 0x429   :  { %v747_v34 = vpop.permute.xlu1 %746  ;;  %v1164_v2 = vld [vmem:[#allocation2 + $0x9] sm:$0x3f] }
 0x42a   :  { %v1146_v5 = vld [vmem:[#allocation2 + $0x8] sm:$0x3f]  ;;  %1871 = vmatmul.msk.f32.gmra.mxu0 %vm51_vm4, %v1164_v2  ;;  %1881 = vmatmul.msk.f32.gmra.mxu1 %vm51_vm4, %v1164_v2  ;;  %v748_v38 = vrot.slane %v747_v34, 6  ;;  %v1488_v2 = vld [vmem:[%s3067_s11 + $0x68] sm:$0xff] }
 0x42b   :  { %1883 = vmatmul.msk.f32.gmra.mxu2 %vm51_vm4, %v1146_v5  ;;  %1885 = vmatmul.msk.f32.gmra.mxu3 %vm51_vm4, %v1146_v5  ;;  %v1285_v9 = vld [vmem:[#allocation2 + $0x2] sm:$0xff]  ;;  %v1286_v13 = vld [vmem:[#allocation2 + $0xa] sm:$0x3f] }
 0x42c   :  { %v750_v12 = vsel %vm749_vm1, %v748_v38, %v747_v34  ;;  %v1521_v34 = vld [vmem:[%s3067_s11 + $0x170] sm:$0xff]  ;;  %v1504_v5 = vld [vmem:[%s3067_s11 + $0xe8] sm:$0xff]  ;;  %1542 = vmatpush.msrb.mxu0 %v1488_v2  ;;  %v1625_v2 = vld [vmem:[%s3069_s13 + $0x20] sm:$0xff] }
 0x42d   :  { %v1520_v38 = vld [vmem:[%s3067_s11 + $0x168] sm:$0xff]  ;;  %1562 = vmatpush.msra.mxu1 %v1504_v5  ;;  %v1624_v5 = vld [vmem:[%s3069_s13 + $0x18] sm:$0xff] }
 0x431   :  { %v739_v8 = vpop.permute.xlu1 %738 }
 0x432   :  { %742 = vst.msk [vmem:[#allocation3 + $0x2] sm:$0x1] %vm741_vm3, %v739_v8  ;;  %1894 = vmatmul.msk.f32.vlgmr.msra.gmra.mxu0 %vm51_vm4, %v1285_v9  ;;  %1904 = vmatmul.msk.f32.vlgmr.msrb.gmra.mxu1 %vm51_vm4, %v1285_v9  ;;  %v1487_v8 = vld [vmem:[%s3067_s11 + $0x60] sm:$0xff] }
 0x433   :  { %755 = vst.msk [vmem:[#allocation3 + $0x2] sm:$0x5] %vm2805_vm5, %v750_v12  ;;  %v1503_v9 = vld [vmem:[%s3067_s11 + $0xe0] sm:$0xff]  ;;  %1543 = vmatpush.msrb.mxu0 %v1487_v8  ;;  %v1622_v8 = vld [vmem:[%s3069_s13 + $0x8] sm:$0xff] }
 0x434   :  { %v1519_v12 = vld [vmem:[%s3067_s11 + $0x160] sm:$0xff]  ;;  %1563 = vmatpush.msra.mxu1 %v1503_v9 }
 0x435   :  { %v1621_v9 = vld [vmem:[%s3069_s13] sm:$0xff] }
 0x43a   :  { %1895 = vmatmul.msk.f32.gmra.mxu0 %vm51_vm4, %v1286_v13  ;;  %1905 = vmatmul.msk.f32.gmra.mxu1 %vm51_vm4, %v1286_v13  ;;  %vm776_vm4 = vcmask 59394   ;;  %v1486_v13 = vld [vmem:[%s3067_s11 + $0x58] sm:$0xff] }
 0x43b   :  { %1544 = vmatpush.msrb.mxu0 %v1486_v13 }
 0x49f   :  { %v1196_v4 = vpop.f32.mrf.mxu0  ;;  %v1227_v6 = vpop.f32.mrf.mxu1 }
 0x4a6   :  { %v1256_v22 = vpop.f32.mrf.mxu2  ;;  %v1279_v23 = vpop.f32.mrf.mxu3 }
 0x4a7   :  { %v1199_v7 = vpop.f32.mrf.mxu0  ;;  %v1230_v10 = vpop.f32.mrf.mxu1  ;;  %v1257_v16 = vadd.f32 %v1256_v22, %v1196_v4  ;;  %v1280_v46 = vadd.f32 %v1279_v23, %v1227_v6  ;;  %v1502_v4 = vld [vmem:[%s3067_s11 + $0xd8] sm:$0xff]  ;;  %v1517_v22 = vld [vmem:[%s3067_s11 + $0x150] sm:$0xff]  ;;  %v1484_v23 = vld [vmem:[%s3067_s11 + $0x48] sm:$0xff] }
 0x4a8   :  { %v1518_v6 = vld [vmem:[%s3067_s11 + $0x158] sm:$0xff]  ;;  %1564 = vmatpush.msra.mxu1 %v1502_v4 }
 0x4ae   :  { %v1259_v63 = vpop.f32.mrf.mxu2  ;;  %v1282_v15 = vpop.f32.mrf.mxu3 }
 0x4af   :  { %v1318_v50 = vpop.f32.mrf.mxu0  ;;  %v1349_v57 = vpop.f32.mrf.mxu1  ;;  %v1260_v17 = vadd.f32 %v1259_v63, %v1199_v7  ;;  %v1283_v53 = vadd.f32 %v1282_v15, %v1230_v10  ;;  %v1485_v7 = vld [vmem:[%s3067_s11 + $0x50] sm:$0xff]  ;;  %v1515_v63 = vld [vmem:[%s3067_s11 + $0x140] sm:$0xff]  ;;  %v1482_v15 = vld [vmem:[%s3067_s11 + $0x38] sm:$0xff] }
 0x4b0   :  { %v1355_v11 = vadd.f32 %v1318_v50, %v1257_v16  ;;  %v1357_v14 = vadd.f32 %v1349_v57, %v1280_v46  ;;  %v1501_v10 = vld [vmem:[%s3067_s11 + $0xd0] sm:$0xff]  ;;  %1545 = vmatpush.msrb.mxu0 %v1485_v7  ;;  %v1500_v50 = vld [vmem:[%s3067_s11 + $0xc8] sm:$0xff]  ;;  %v1483_v16 = vld [vmem:[%s3067_s11 + $0x40] sm:$0xff] }
 0x4b1   :  { %1565 = vmatpush.msra.mxu1 %v1501_v10  ;;  %v1516_v57 = vld [vmem:[%s3067_s11 + $0x148] sm:$0xff]  ;;  %v1499_v46 = vld [vmem:[%s3067_s11 + $0xc0] sm:$0xff] }
 0x4b2   :  { %v1359_v61 = vmax.f32 %v1355_v11, %v1357_v14  ;;  %1546 = vmatpush.msrb.mxu0 %v1484_v23  ;;  %v1498_v11 = vld [vmem:[%s3067_s11 + $0xb8] sm:$0xff] }
 0x4b3   :  { %1566 = vmatpush.msra.mxu1 %v1500_v50  ;;  %v1514_v14 = vld [vmem:[%s3067_s11 + $0x138] sm:$0xff] }
 0x4b4   :  { %v1365_v62 = vadd.f32 %v1936_v27, %v1359_v61  ;;  %1547 = vmatpush.msrb.mxu0 %v1483_v16  ;;  %v1496_v61 = vld [vmem:[%s3067_s11 + $0xa8] sm:$0xff]  ;;  %v1938_v16 = vld [vmem:[%s3070_s14] ss:$0 sm:$0xff] }
 0x4b5   :  { %1567 = vmatpush.msra.mxu1 %v1499_v46 }
 0x4b6   :  { %v1367_v30 = vmax.f32 %v1365_v62, 0.0  ;;  %1548 = vmatpush.msrb.mxu0 %v1482_v15  ;;  %v1478_v62 = vld [vmem:[%s3067_s11 + $0x18] sm:$0xff] }
 0x4b7   :  { %v1321_v54 = vpop.f32.mrf.mxu0  ;;  %v1352_v58 = vpop.f32.mrf.mxu1  ;;  %1568 = vmatpush.msra.mxu1 %v1498_v11 }
 0x4b8   :  { %v1356_v20 = vadd.f32 %v1321_v54, %v1260_v17  ;;  %v1358_v21 = vadd.f32 %v1352_v58, %v1283_v53  ;;  %v1481_v17 = vld [vmem:[%s3067_s11 + $0x30] sm:$0xff]  ;;  %v1480_v58 = vld [vmem:[%s3067_s11 + $0x28] sm:$0xff] }
 0x4b9   :  { %v1497_v53 = vld [vmem:[%s3067_s11 + $0xb0] sm:$0xff]  ;;  %1549 = vmatpush.msrb.mxu0 %v1481_v17 }
 0x4ba   :  { %v1360_v49 = vmax.f32 %v1356_v20, %v1358_v21  ;;  %v1513_v54 = vld [vmem:[%s3067_s11 + $0x130] sm:$0xff]  ;;  %1569 = vmatpush.msra.mxu1 %v1497_v53  ;;  %v1512_v20 = vld [vmem:[%s3067_s11 + $0x128] sm:$0xff] }
 0x4bb   :  { %1550 = vmatpush.msrb.mxu0 %v1480_v58 }
 0x4bc   :  { %v1366_v26 = vadd.f32 %v1936_v27, %v1360_v49  ;;  %1570 = vmatpush.msra.mxu1 %v1496_v61  ;;  %v1479_v27 = vld [vmem:[%s3067_s11 + $0x20] sm:$0xff] }
 0x4bd   :  { %v1495_v49 = vld [vmem:[%s3067_s11 + $0xa0] sm:$0xff]  ;;  %1551 = vmatpush.msrb.mxu0 %v1479_v27 }
 0x4be   :  { %v1368_v24 = vmax.f32 %v1366_v26, 0.0  ;;  %v1511_v26 = vld [vmem:[%s3067_s11 + $0x120] sm:$0xff]  ;;  %1571 = vmatpush.msra.mxu1 %v1495_v49 }
 0x4bf   :  { %1552 = vmatpush.msrb.mxu0 %v1478_v62 }
 0x4c0   :  { %1906 = vmatpush.msk.msrb.mxu2 %vm88_vm0, %v1368_v24  ;;  %1908 = vmatpush.msk.msrb.mxu3 %vm88_vm0, %v1368_v24  ;;  %vm775_vm0 = vcmask 1041024   ;;  %v1494_v24 = vld [vmem:[%s3067_s11 + $0x98] sm:$0xff] }
 0x4c1   :  { %1572 = vmatpush.msra.mxu1 %v1494_v24 }
 0x4c2   :  { %1391 = vmatpush.msrb.mxu2 %v1367_v30  ;;  %1415 = vmatpush.msrb.mxu3 %v1367_v30  ;;  %v1510_v30 = vld [vmem:[%s3067_s11 + $0x118] sm:$0xff] }
 0x4c3   :  { %1907 = vmatmul.msk.f32.vlgmr.msrb.gmra.mxu2 %vm658_vm7, %v1369_v43  ;;  %1909 = vmatmul.msk.f32.vlgmr.msrb.gmra.mxu3 %vm658_vm7, %v1396_v44  ;;  %vm764_vm7 = vcmask 647360   ;;  %v1477_v43 = vld [vmem:[%s3067_s11 + $0x10] sm:$0xff] }
 0x4c4   :  { %1580 = vmatpush.msra.mxu2 %v1522_v31  ;;  %v1493_v44 = vld [vmem:[%s3067_s11 + $0x90] sm:$0xff]  ;;  %1553 = vmatpush.msrb.mxu0 %v1477_v43 }
 0x4c5   :  { %1573 = vmatpush.msra.mxu1 %v1493_v44 }
 0x4c6   :  { %1581 = vmatpush.msra.mxu2 %v1521_v34  ;;  %v1627_v34 = vld [vmem:[%s3069_s13 + $0x30] sm:$0xff] }
 0x4c8   :  { %1582 = vmatpush.msra.mxu2 %v1520_v38  ;;  %v1623_v38 = vld [vmem:[%s3069_s13 + $0x10] sm:$0xff] }
 0x4ca   :  { %1583 = vmatpush.msra.mxu2 %v1519_v12  ;;  %v1937_v12 = vld [vmem:[%s3068_s12] ss:$0 sm:$0xff]  ;;  %s1977_s12 = smov [#allocation4]  }
 0x4cc   :  { %1584 = vmatpush.msra.mxu2 %v1518_v6 }
 0x4ce   :  { %1585 = vmatpush.msra.mxu2 %v1517_v22 }
 0x4d0   :  { %1586 = vmatpush.msra.mxu2 %v1516_v57 }
 0x4d2   :  { %1587 = vmatpush.msra.mxu2 %v1515_v63 }
 0x4d4   :  { %1588 = vmatpush.msra.mxu2 %v1514_v14 }
 0x4d6   :  { %1589 = vmatpush.msra.mxu2 %v1513_v54 }
 0x4d8   :  { %1590 = vmatpush.msra.mxu2 %v1512_v20 }
 0x4da   :  { %1591 = vmatpush.msra.mxu2 %v1511_v26 }
 0x4dc   :  { %1592 = vmatpush.msra.mxu2 %v1510_v30 }
 0x546   :  { %v1393_v47 = vpop.f32.mrf.mxu2  ;;  %v1417_v48 = vpop.f32.mrf.mxu3 }
 0x547   :  { %v1420_v51 = vmax.f32 %v1393_v47, %v1417_v48  ;;  %v1509_v47 = vld [vmem:[%s3067_s11 + $0x110] sm:$0xff]  ;;  %v1476_v48 = vld [vmem:[%s3067_s11 + $0x8] sm:$0xff] }
 0x548   :  { %1593 = vmatpush.msra.mxu2 %v1509_v47  ;;  %1554 = vmatpush.msrb.mxu0 %v1476_v48 }
 0x549   :  { %1429 = vst.sshfl [vmem:[#allocation1] sm:$0xff pattern:$0x73625140] %v1420_v51  ;;  %v1910_v52 = vrot.slane %v1420_v51, 9 }
 0x54a   :  { %1421 = vst.msk [vmem:[#allocation3 + $0x1] sm:$0x1] %vm710_vm8, %v1420_v51  ;;  %vm2841_vm8 = vmor %vm776_vm4, %vm775_vm0 }
 0x54b   :  { %1425 = vrot.lane.b32.xlu2 %v1910_v52, %s1971_s0  ;;  %v1508_v52 = vld [vmem:[%s3067_s11 + $0x108] sm:$0xff] }
 0x54c   :  { %1594 = vmatpush.msra.mxu2 %v1508_v52 }
 0x550   :  { %v1431_v55 = vld [vmem:[#allocation1 + $0x1] ss:$4 sm:$0xff] }
 0x551   :  { %1438 = vst.sshfl [vmem:[#allocation1] sm:$0xff pattern:$0x73625140] %v1420_v51 }
 0x553   :  { %1432 = vrot.lane.b32.xlu2 %v1431_v55, %s1972_s28  ;;  %v1523_v55 = vld [vmem:[%s3067_s11 + $0x180] sm:$0xff] }
 0x554   :  { %1615 = vmatpush.msra.mxu3 %v1523_v55 }
 0x558   :  { %v1440_v56 = vld [vmem:[#allocation1 + $0x1] ss:$4 sm:$0xff] }
 0x559   :  { %v1911_v60 = vrot.slane %v1440_v56, 9  ;;  %1447 = vst.sshfl [vmem:[#allocation1] sm:$0xff pattern:$0x73625140] %v1420_v51  ;;  %v1475_v56 = vld [vmem:[%s3067_s11] sm:$0xff] }
 0x55a   :  { %1555 = vmatpush.msrb.mxu0 %v1475_v56 }
 0x55b   :  { %761 = vrot.lane.b32.xlu2 %v1797_v59, %s1976_s8  ;;  %1443 = vrot.lane.b32.xlu0 %v1911_v60, %s1975_s4  ;;  %v1491_v59 = vld [vmem:[%s3067_s11 + $0x80] sm:$0xff] }
 0x560   :  { %v1449_v18 = vld [vmem:[#allocation1 + $0x2] ss:$4 sm:$0xff] }
 0x561   :  { %1456 = vst.sshfl [vmem:[#allocation1] sm:$0xff pattern:$0x73625140] %v1420_v51 }
 0x563   :  { %1450 = vrot.lane.b32.xlu0 %v1449_v18, %s1974_s3  ;;  %v1507_v18 = vld [vmem:[%s3067_s11 + $0x100] sm:$0xff] }
 0x564   :  { %1595 = vmatpush.msra.mxu2 %v1507_v18 }
 0x568   :  { %v1458_v19 = vld [vmem:[#allocation1 + $0x2] ss:$4 sm:$0xff] }
 0x569   :  { %v1912_v29 = vrot.slane %v1458_v19, 9  ;;  %1465 = vst.sshfl [vmem:[#allocation1] sm:$0xff pattern:$0x73625140] %v1420_v51  ;;  %v1492_v51 = vld [vmem:[%s3067_s11 + $0x88] sm:$0xff]  ;;  %s1686_s11 = sshll.u32 %s3071_s15, 4  ;;  %s1687_s11 = int_to_ptr.hbm [resolvable:$true] %s1686_s11 }
 0x56a   :  { %1574 = vmatpush.msra.mxu1 %v1492_v51 }
 0x56b   :  { %1461 = vrot.lane.b32.xlu0 %v1912_v29, %s1976_s8 }
 0x56c   :  { %1575 = vmatpush.msra.mxu1 %v1491_v59 }
 0x570   :  { %v1467_v32 = vld [vmem:[#allocation1 + $0x3] ss:$4 sm:$0xff] }
 0x571   :  { %1468 = vrot.lane.b32.xlu1 %v1467_v32, %s1973_s16  ;;  %v1633_v32 = vld [vmem:[%s3069_s13 + $0x60] sm:$0xf] }
 0x572   :  { %1914 = vmatpush.msk.msrb.mxu3 %vm357_vm2, %v1633_v32  ;;  %vm1537_vm2 = vcmask 64512  }
 0x574   :  { %1649 = vmatpush.msrb.mxu3 %v1632_v33 }
 0x5a5   :  { %v1426_v36 = vpop.permute.xlu2 %1425 }
 0x5a6   :  { %1428 = vst.msk [vmem:[#allocation3 + $0x1] sm:$0x1] %vm718_vm12, %v1426_v36  ;;  %v1631_v36 = vld [vmem:[%s3069_s13 + $0x50] sm:$0xff] }
 0x5a7   :  { %1650 = vmatpush.msrb.mxu3 %v1631_v36 }
 0x5ad   :  { %v1433_v25 = vpop.permute.xlu2 %1432 }
 0x5ae   :  { %v1434_v37 = vrot.slane %v1433_v25, 6 }
 0x5b0   :  { %v1435_v40 = vsel %vm726_vm11, %v1434_v37, %v1433_v25  ;;  %v1630_v25 = vld [vmem:[%s3069_s13 + $0x48] sm:$0xff] }
 0x5b1   :  { %1437 = vst.msk [vmem:[#allocation3 + $0x1] sm:$0x5] %vm2781_vm13, %v1435_v40  ;;  %1651 = vmatpush.msrb.mxu3 %v1630_v25  ;;  %v1628_v40 = vld [vmem:[%s3069_s13 + $0x38] sm:$0xff]  ;;  %s1684_s13 = sshll.u32 %s1977_s12, 4  ;;  %s1685_s13 = int_to_ptr.vmem [resolvable:$true] %s1684_s13 }
 0x5b3   :  { %1652 = vmatpush.msrb.mxu3 %v1629_v39 }
 0x5b5   :  { %v762_v45 = vpop.permute.xlu2 %761  ;;  %1653 = vmatpush.msrb.mxu3 %v1628_v40 }
 0x5b6   :  { %765 = vst.msk [vmem:[#allocation3 + $0x4] sm:$0x1] %vm764_vm7, %v762_v45 }
 0x5b7   :  { %778 = vst.msk [vmem:[#allocation3 + $0x4] sm:$0x5] %vm2841_vm8, %v773_v0  ;;  %1654 = vmatpush.msrb.mxu3 %v1627_v34 }
 0x5b9   :  { %1655 = vmatpush.msrb.mxu3 %v1626_v42 }
 0x5bb   :  { %1656 = vmatpush.msrb.mxu3 %v1625_v2 }
 0x5bd   :  { %1657 = vmatpush.msrb.mxu3 %v1624_v5 }
 0x5bf   :  { %1658 = vmatpush.msrb.mxu3 %v1623_v38 }
 0x5c1   :  { %1659 = vmatpush.msrb.mxu3 %v1622_v8 }
 0x5c3   :  { %1660 = vmatpush.msrb.mxu3 %v1621_v9 }
 0x5cd   :  { %v1444_v21 = vpop.permute.xlu0 %1443 }
 0x5ce   :  { %1446 = vst.msk [vmem:[#allocation3 + $0x3] sm:$0x1] %vm741_vm3, %v1444_v21 }
 0x5d5   :  { %v1451_v60 = vpop.permute.xlu0 %1450 }
 0x5d6   :  { %v1452_v19 = vrot.slane %v1451_v60, 6 }
 0x5d8   :  { %v1453_v29 = vsel %vm749_vm1, %v1452_v19, %v1451_v60 }
 0x5d9   :  { %1455 = vst.msk [vmem:[#allocation3 + $0x3] sm:$0x5] %vm2805_vm5, %v1453_v29 }
 0x5dd   :  { %v1462_v37 = vpop.permute.xlu0 %1461 }
 0x5de   :  { %1464 = vst.msk [vmem:[#allocation3 + $0x5] sm:$0x1] %vm764_vm7, %v1462_v37 }
 0x5e3   :  { %v1469_v41 = vpop.permute.xlu1 %1468 }
 0x5e4   :  { %v1470_v45 = vrot.slane %v1469_v41, 6 }
 0x5e6   :  { %v1471_v0 = vsel %vm772_vm6, %v1470_v45, %v1469_v41 }
 0x5e7   :  { %1473 = vst.msk [vmem:[#allocation3 + $0x5] sm:$0x5] %vm2841_vm8, %v1471_v0 }
 0x5ee   :  { %v1474_v28 = vld [vmem:[#allocation3] sm:$0xff] }
 0x5ef   :  { %1529 = vst [vmem:[#allocation1] ss:$4 sm:$0xff] %v1474_v28 }
 0x5f6   :  { %v1530_v1 = vld.sshfl [vmem:[#allocation1] sm:$0xff pattern:$0x73625140]  ;;  %v1531_v31 = vld.sshfl [vmem:[#allocation1 + $0x8] sm:$0xff pattern:$0x73625140] }
 0x5f7   :  { %1556 = vmatmul.f32.vlgmr.msrb.gmra.mxu0 %v1530_v1  ;;  %1576 = vmatmul.f32.vlgmr.msra.gmra.mxu1 %v1531_v31  ;;  %v1532_v3 = vld.sshfl [vmem:[#allocation1 + $0x10] sm:$0xff pattern:$0x73625140]  ;;  %v1533_v35 = vld.sshfl [vmem:[#allocation1 + $0x18] sm:$0xff pattern:$0x73625140] }
 0x5f8   :  { %1596 = vmatmul.f32.vlgmr.msra.gmra.mxu2 %v1532_v3  ;;  %1913 = vmatmul.msk.f32.vlgmr.msra.gmra.mxu3 %vm1537_vm2, %v1533_v35 }
 0x674   :  { %v1557_v13 = vpop.f32.mrf.mxu0  ;;  %v1577_v6 = vpop.f32.mrf.mxu1 }
 0x675   :  { %v1558_v4 = vadd.f32 %v1937_v12, %v1557_v13 }
 0x677   :  { %v1578_v7 = vadd.f32 %v1577_v6, %v1558_v4 }
 0x67b   :  { %v1597_v10 = vpop.f32.mrf.mxu2  ;;  %v1617_v23 = vpop.f32.mrf.mxu3 }
 0x67c   :  { %v1598_v22 = vadd.f32 %v1597_v10, %v1578_v7 }
 0x67e   :  { %v1618_v50 = vadd.f32 %v1617_v23, %v1598_v22 }
 0x680   :  { %v1620_v57 = vmax.f32 %v1618_v50, 0.0 }
 0x682   :  { %1915 = vmatmul.msk.f32.vlgmr.msrb.gmra.mxu3 %vm1638_vm9, %v1620_v57 }
 0x705   :  { %v1662_v46 = vpop.f32.mrf.mxu3 }
 0x706   :  { %v1663_v63 = vadd.f32 %v1938_v16, %v1662_v46 }
 0x708   :  { %v1666_v15 = vsel %vm1665_vm10, %v1663_v63, -inf }
 0x709   :  { %1667 = vmax.xlane.f32.xlu1 %v1666_v15 }
 0x77c   :  { %v1668_v11 = vpop.xlane.xlu1 %1667 }
 0x77d   :  { %v1669_v14 = vsub.f32 %v1663_v63, %v1668_v11 }
 0x77f   :  { %v1670_v17 = vmul.f32 1.442695, %v1669_v14 }
 0x781   :  { %1939 = vpow2.f32 %v1670_v17 }
 0x787   :  { %v1940_v53 = vpop.eup %1939 }
 0x788   :  { %v1672_v54 = vsel %vm1665_vm10, %v1940_v53, 0.0 }
 0x789   :  { %1673 = vadd.xlane.f32.xlu2 %v1672_v54 }
 0x7fc   :  { %v1674_v58 = vpop.xlane.xlu2 %1673 }
 0x7fd   :  { %1941 = vlog2.f32 %v1674_v58 }
 0x803   :  { %v1942_v61 = vpop.eup %1941 }
 0x804   :  { %v1676_v20 = vmul.f32 0.6931472, %v1942_v61 }
 0x806   :  { %v1677_v21 = vsub.f32 %v1669_v14, %v1676_v20 }
 0x808   :  { %1678 = vst.msk [vmem:[#allocation4] sm:$0x3] %vm1665_vm10, %v1677_v21 }
 0x809   :  { %1689 = dma.vmem_to_hbm [thread:$0]  %s1685_s13, 32, %s1687_s11, [#allocation5]  }
 0x80a   :  { %1967 = dma.done.wait [#allocation5], 32  }
 0x80b   :  { %1968 = vsyncadd [#allocation5], 4294967264 }
 0x80c   :  { %1694 = vsyncpa [#allocation5], 1 }

</bundles_post_ra>
